<compile_context>
chip_gen: v5e
topology: v5e:2x2
jax: 0.10.0
libtpu: 0.0.40
codegen_flags: <defaults>
</compile_context>

<pallas_src>
import functools

import jax
import jax.numpy as jnp
import numpy as np
from jax.experimental import pallas as pl
from jax.experimental.pallas import tpu as pltpu

NEG_SLOPE = 0.01  # torch.nn.LeakyReLU default


def _lrelu(v):
    return jnp.where(v > 0, v, NEG_SLOPE * v)


def _convgen_kernel(x_ref, w_lat1_ref, w_lat2_ref, w_conv_ref, w_shift_ref,
                    w_sb2_ref, b_sb2_ref, w_lin_ref, b_lin_ref,
                    w_fc_ref, b_fc_ref, out_ref, *, B, L, H, C2):
    # Layouts (all f32, channels on the lane axis, batch*length on sublanes):
    #   x_ref      : (B*L, 1)
    #   w_lat1_ref : (1, H)       Conv1d(1,H,k=1) weight row
    #   w_lat2_ref : (5*H, H)     Conv1d(H,H,k=5,d=2,p=4), row = k*H + cin
    #   w_conv_ref : (3*H, H)     Conv1d(H,H,k=3,d=2,p=2), row = k*H + cin
    #   w_shift_ref: (3*H, C2)    Conv1d(H,C2,k=3,d=2,p=2), row = k*H + cin
    #   w_sb2_ref  : (L*C2, H)    Linear(C2*L,H), row l*C2+c == W[:, c*L+l]
    #   w_lin_ref  : (H, H)       Linear(H,H) weight, transposed
    #   w_fc_ref   : (H, TS)      Linear(H,TS) weight, transposed
    #   out_ref    : (B, TS)

    def dconv(v2d, w_packed, *, pad, dil, K):
        """'Same'-length dilated Conv1d as a single im2col matmul.

        v2d: (B*L, Cin).  Builds LHS (B*L, K*Cin) from K statically shifted
        views of the zero-padded activation (pure value ops: zeros + concat +
        static slices; shifts land on the XLU, not on vld/vst), then does one
        MXU matmul against the pre-packed (K*Cin, Cout) weight.
        """
        Cin = v2d.shape[-1]
        v3 = v2d.reshape(B, L, Cin)
        z = jnp.zeros((B, pad, Cin), jnp.float32)
        p3 = jnp.concatenate([z, v3, z], axis=1)              # (B, L+2*pad, Cin)
        lhs = jnp.concatenate(
            [p3[:, k * dil:k * dil + L, :] for k in range(K)], axis=-1)
        return jnp.dot(lhs.reshape(B * L, K * Cin), w_packed,
                       preferred_element_type=jnp.float32)    # (B*L, Cout)

    # Hoist all weight reads (values reused across the unrolled residual loops).
    w_lat1 = w_lat1_ref[...]
    w_lat2 = w_lat2_ref[...]
    w_conv = w_conv_ref[...]
    w_shift = w_shift_ref[...]
    w_sb2 = w_sb2_ref[...]
    b_sb2 = b_sb2_ref[...]
    w_lin = w_lin_ref[...]
    b_lin = b_lin_ref[...]
    w_fc = w_fc_ref[...]
    b_fc = b_fc_ref[...]

    # ---- latent block: Conv1d(1,H,k=1) == outer product, then k=5 d=2 conv ----
    h = _lrelu(x_ref[...] * w_lat1)                            # (B*L, H)
    h = _lrelu(dconv(h, w_lat2, pad=4, dil=2, K=5))

    # ---- three residual dilated conv blocks (shared weights) ----
    for _ in range(3):
        h = _lrelu(dconv(h, w_conv, pad=2, dil=2, K=3)) + h

    # ---- shifting block: Conv1d(H, C2, k=3, d=2, p=2) ----
    s = _lrelu(dconv(h, w_shift, pad=2, dil=2, K=3))           # (B*L, C2)

    # ---- shifting_block2: Linear(C2*L, H) as ONE (B, L*C2) x (L*C2, H) matmul ----
    # flat[b, l*C2 + c] = s[b*L + l, c]; w_sb2 rows are packed to match.
    s3 = s.reshape(B, L, C2)
    flat = jnp.concatenate([s3[:, l, :] for l in range(L)], axis=-1)   # (B, L*C2)
    v = _lrelu(jnp.dot(flat, w_sb2, preferred_element_type=jnp.float32) + b_sb2)

    # ---- three residual linear blocks (shared weights), batched over B ----
    for _ in range(3):
        v = _lrelu(jnp.dot(v, w_lin, preferred_element_type=jnp.float32)
                   + b_lin) + v

    # ---- final fc: lane-dense (B, TS) store ----
    out_ref[...] = jnp.dot(v, w_fc, preferred_element_type=jnp.float32) + b_fc


def conv_generator_forward(x, params):
    """x: (B, 1, latent_dim) float32 (PyTorch NCL). Returns (B, 1, ts_dim)."""
    B, _, L = x.shape
    H = params['w_lin'].shape[0]
    C2 = params['w_shift'].shape[0]
    TS = params['w_fc'].shape[0]

    # ---- glue: layout / weight re-packing in plain JAX ----
    # Activations are (batch*length, channel); weights packed taps-major so
    # every conv is a single (B*L, K*Cin) x (K*Cin, Cout) matmul.
    x_2d = jnp.transpose(x, (0, 2, 1)).reshape(B * L, 1).astype(jnp.float32)
    w_lat1 = params['w_lat1'].reshape(1, H)                               # (H,1,1)
    w_lat2 = jnp.transpose(params['w_lat2'], (2, 1, 0)).reshape(5 * H, H)
    w_conv = jnp.transpose(params['w_conv'], (2, 1, 0)).reshape(3 * H, H)
    w_shift = jnp.transpose(params['w_shift'], (2, 1, 0)).reshape(3 * H, C2)
    # Linear(C2*L, H): packed row l*C2 + c  <-  W[h, c*L + l]
    w_sb2 = jnp.transpose(params['w_sb2'].reshape(H, C2, L),
                          (2, 1, 0)).reshape(L * C2, H)
    b_sb2 = params['b_sb2'].reshape(1, H)
    w_lin = jnp.transpose(params['w_lin'])                                # (H, H)
    b_lin = params['b_lin'].reshape(1, H)
    w_fc = jnp.transpose(params['w_fc'])                                  # (H, TS)
    b_fc = params['b_fc'].reshape(1, TS)

    kernel = functools.partial(_convgen_kernel, B=B, L=L, H=H, C2=C2)
    vmem = pl.BlockSpec(memory_space=pltpu.MemorySpace.VMEM)  # whole array in VMEM

    # Single invocation (no grid): the whole batch is processed at once, every
    # weight is DMA'd into VMEM exactly once (total footprint << VMEM on
    # v5e/v6e/v7x), and there is no per-grid-step overhead.
    out_2d = pl.pallas_call(
        kernel,
        out_shape=jax.ShapeDtypeStruct((B, TS), jnp.float32),
        in_specs=[vmem] * 11,
        out_specs=vmem,
    )(x_2d, w_lat1, w_lat2, w_conv, w_shift, w_sb2, b_sb2,
      w_lin, b_lin, w_fc, b_fc)
    return out_2d[:, None, :]                                  # (B, 1, TS)


def reference_forward(x, params):
    """Pure-JAX replica of the PyTorch forward (for verification)."""
    lrelu = lambda v: jnp.where(v > 0, v, NEG_SLOPE * v)

    def conv1d(v, w, dil, pad):
        return jax.lax.conv_general_dilated(
            v, w, window_strides=(1,), padding=[(pad, pad)],
            rhs_dilation=(dil,), dimension_numbers=('NCH', 'OIH', 'NCH'))

    out = lrelu(conv1d(x, params['w_lat1'], 1, 0))
    out = lrelu(conv1d(out, params['w_lat2'], 2, 4))
    cb = lambda v: lrelu(conv1d(v, params['w_conv'], 2, 2))
    out2 = cb(out) + out
    out3 = cb(out2) + out2
    out4 = cb(out3) + out3
    out4 = lrelu(conv1d(out4, params['w_shift'], 2, 2))
    out4 = out4.reshape(out4.shape[0], -1)
    out4 = lrelu(out4 @ params['w_sb2'].T + params['b_sb2'])
    lb = lambda v: lrelu(v @ params['w_lin'].T + params['b_lin'])
    out5 = lb(out4) + out4
    out6 = lb(out5) + out5
    out7 = lb(out6) + out6
    res = out7 @ params['w_fc'].T + params['b_fc']
    return res[:, None, :]


if __name__ == "__main__":
    B, LATENT, TS, H, C2 = 2, 16, 12, 32, 10   # latent_dim=16, ts_dim=12, hidden=32, hidden2=10
    key = jax.random.PRNGKey(0)
    keys = jax.random.split(key, 11)
    sc = 0.1
    params = {
        'w_lat1': jax.random.normal(keys[0], (H, 1, 1), jnp.float32) * sc,
        'w_lat2': jax.random.normal(keys[1], (H, H, 5), jnp.float32) * sc,
        'w_conv': jax.random.normal(keys[2], (H, H, 3), jnp.float32) * sc,
        'w_shift': jax.random.normal(keys[3], (C2, H, 3), jnp.float32) * sc,
        'w_sb2': jax.random.normal(keys[4], (H, C2 * LATENT), jnp.float32) * sc,
        'b_sb2': jax.random.normal(keys[5], (H,), jnp.float32) * sc,
        'w_lin': jax.random.normal(keys[6], (H, H), jnp.float32) * sc,
        'b_lin': jax.random.normal(keys[7], (H,), jnp.float32) * sc,
        'w_fc': jax.random.normal(keys[8], (TS, H), jnp.float32) * sc,
        'b_fc': jax.random.normal(keys[9], (TS,), jnp.float32) * sc,
    }
    x = jax.random.normal(keys[10], (B, 1, LATENT), jnp.float32)

    out = conv_generator_forward(x, params)
    out = jax.block_until_ready(out)
    assert out.shape == (B, 1, TS), out.shape

    ref = reference_forward(x, params)
    np.testing.assert_allclose(np.asarray(out), np.asarray(ref),
                               rtol=2e-2, atol=2e-3)
    print("KERNEL_OK")
</pallas_src>

<mosaic_0001>
module attributes {stable_mosaic.version = 11 : i64} {
  func.func @_convgen_kernel(%arg0: memref<32x1xf32, #tpu.memory_space<vmem>>, %arg1: memref<1x32xf32, #tpu.memory_space<vmem>>, %arg2: memref<160x32xf32, #tpu.memory_space<vmem>>, %arg3: memref<96x32xf32, #tpu.memory_space<vmem>>, %arg4: memref<96x10xf32, #tpu.memory_space<vmem>>, %arg5: memref<160x32xf32, #tpu.memory_space<vmem>>, %arg6: memref<1x32xf32, #tpu.memory_space<vmem>>, %arg7: memref<32x32xf32, #tpu.memory_space<vmem>>, %arg8: memref<1x32xf32, #tpu.memory_space<vmem>>, %arg9: memref<32x12xf32, #tpu.memory_space<vmem>>, %arg10: memref<1x12xf32, #tpu.memory_space<vmem>>, %arg11: memref<2x12xf32, #tpu.memory_space<vmem>>) attributes {dimension_semantics = [], scalar_prefetch = 0 : i64, scratch_operands = 0 : i64, tpu.core_type = #tpu.core_type<tc>} {
    %c0 = arith.constant 0 : index
    %c0_0 = arith.constant 0 : index
    %0 = vector.load %arg1[%c0, %c0_0] : memref<1x32xf32, #tpu.memory_space<vmem>>, vector<1x32xf32>
    %c0_1 = arith.constant 0 : index
    %c0_2 = arith.constant 0 : index
    %1 = vector.load %arg2[%c0_1, %c0_2] : memref<160x32xf32, #tpu.memory_space<vmem>>, vector<160x32xf32>
    %c0_3 = arith.constant 0 : index
    %c0_4 = arith.constant 0 : index
    %2 = vector.load %arg3[%c0_3, %c0_4] : memref<96x32xf32, #tpu.memory_space<vmem>>, vector<96x32xf32>
    %c0_5 = arith.constant 0 : index
    %c0_6 = arith.constant 0 : index
    %3 = vector.load %arg4[%c0_5, %c0_6] : memref<96x10xf32, #tpu.memory_space<vmem>>, vector<96x10xf32>
    %c0_7 = arith.constant 0 : index
    %c0_8 = arith.constant 0 : index
    %4 = vector.load %arg5[%c0_7, %c0_8] : memref<160x32xf32, #tpu.memory_space<vmem>>, vector<160x32xf32>
    %c0_9 = arith.constant 0 : index
    %c0_10 = arith.constant 0 : index
    %5 = vector.load %arg6[%c0_9, %c0_10] : memref<1x32xf32, #tpu.memory_space<vmem>>, vector<1x32xf32>
    %c0_11 = arith.constant 0 : index
    %c0_12 = arith.constant 0 : index
    %6 = vector.load %arg7[%c0_11, %c0_12] : memref<32x32xf32, #tpu.memory_space<vmem>>, vector<32x32xf32>
    %c0_13 = arith.constant 0 : index
    %c0_14 = arith.constant 0 : index
    %7 = vector.load %arg8[%c0_13, %c0_14] : memref<1x32xf32, #tpu.memory_space<vmem>>, vector<1x32xf32>
    %c0_15 = arith.constant 0 : index
    %c0_16 = arith.constant 0 : index
    %8 = vector.load %arg9[%c0_15, %c0_16] : memref<32x12xf32, #tpu.memory_space<vmem>>, vector<32x12xf32>
    %c0_17 = arith.constant 0 : index
    %c0_18 = arith.constant 0 : index
    %9 = vector.load %arg10[%c0_17, %c0_18] : memref<1x12xf32, #tpu.memory_space<vmem>>, vector<1x12xf32>
    %c0_19 = arith.constant 0 : index
    %c0_20 = arith.constant 0 : index
    %10 = vector.load %arg0[%c0_19, %c0_20] : memref<32x1xf32, #tpu.memory_space<vmem>>, vector<32x1xf32>
    %11 = vector.broadcast %10 : vector<32x1xf32> to vector<32x32xf32>
    %12 = vector.broadcast %0 : vector<1x32xf32> to vector<32x32xf32>
    %13 = arith.mulf %11, %12 : vector<32x32xf32>
    %cst = arith.constant 0.000000e+00 : f32
    %14 = vector.broadcast %cst : f32 to vector<32x32xf32>
    %15 = arith.cmpf ogt, %13, %14 : vector<32x32xf32>
    %cst_21 = arith.constant 0.00999999977 : f32
    %16 = vector.broadcast %cst_21 : f32 to vector<32x32xf32>
    %17 = arith.mulf %16, %13 : vector<32x32xf32>
    %18 = arith.select %15, %13, %17 : vector<32x32xi1>, vector<32x32xf32>
    %19 = vector.shape_cast %18 : vector<32x32xf32> to vector<2x16x32xf32>
    %cst_22 = arith.constant 0.000000e+00 : f32
    %20 = vector.broadcast %cst_22 : f32 to vector<2x4x32xf32>
    %21 = tpu.concatenate %20, %19, %20 in 1 : vector<2x4x32xf32>, vector<2x16x32xf32>, vector<2x4x32xf32> -> vector<2x24x32xf32>
    %22 = vector.extract_strided_slice %21 {offsets = [0, 0, 0], sizes = [2, 16, 32], strides = [1, 1, 1]} : vector<2x24x32xf32> to vector<2x16x32xf32>
    %23 = vector.extract_strided_slice %21 {offsets = [0, 2, 0], sizes = [2, 16, 32], strides = [1, 1, 1]} : vector<2x24x32xf32> to vector<2x16x32xf32>
    %24 = vector.extract_strided_slice %21 {offsets = [0, 4, 0], sizes = [2, 16, 32], strides = [1, 1, 1]} : vector<2x24x32xf32> to vector<2x16x32xf32>
    %25 = vector.extract_strided_slice %21 {offsets = [0, 6, 0], sizes = [2, 16, 32], strides = [1, 1, 1]} : vector<2x24x32xf32> to vector<2x16x32xf32>
    %26 = vector.extract_strided_slice %21 {offsets = [0, 8, 0], sizes = [2, 16, 32], strides = [1, 1, 1]} : vector<2x24x32xf32> to vector<2x16x32xf32>
    %27 = tpu.concatenate %22, %23, %24, %25, %26 in 2 : vector<2x16x32xf32>, vector<2x16x32xf32>, vector<2x16x32xf32>, vector<2x16x32xf32>, vector<2x16x32xf32> -> vector<2x16x160xf32>
    %28 = vector.shape_cast %27 : vector<2x16x160xf32> to vector<32x160xf32>
    %cst_23 = arith.constant dense<0.000000e+00> : vector<32x32xf32>
    %29 = tpu.matmul %28, %1, %cst_23 {dimension_numbers = #tpu.dot_dimension_numbers<[1], [0], [0], [1], [0, 0, 1, 1], [], []>} : vector<32x160xf32>, vector<160x32xf32>, vector<32x32xf32> -> vector<32x32xf32>
    %cst_24 = arith.constant 0.000000e+00 : f32
    %30 = vector.broadcast %cst_24 : f32 to vector<32x32xf32>
    %31 = arith.cmpf ogt, %29, %30 : vector<32x32xf32>
    %cst_25 = arith.constant 0.00999999977 : f32
    %32 = vector.broadcast %cst_25 : f32 to vector<32x32xf32>
    %33 = arith.mulf %32, %29 : vector<32x32xf32>
    %34 = arith.select %31, %29, %33 : vector<32x32xi1>, vector<32x32xf32>
    %35 = vector.shape_cast %34 : vector<32x32xf32> to vector<2x16x32xf32>
    %cst_26 = arith.constant 0.000000e+00 : f32
    %36 = vector.broadcast %cst_26 : f32 to vector<2x2x32xf32>
    %37 = tpu.concatenate %36, %35, %36 in 1 : vector<2x2x32xf32>, vector<2x16x32xf32>, vector<2x2x32xf32> -> vector<2x20x32xf32>
    %38 = vector.extract_strided_slice %37 {offsets = [0, 0, 0], sizes = [2, 16, 32], strides = [1, 1, 1]} : vector<2x20x32xf32> to vector<2x16x32xf32>
    %39 = vector.extract_strided_slice %37 {offsets = [0, 2, 0], sizes = [2, 16, 32], strides = [1, 1, 1]} : vector<2x20x32xf32> to vector<2x16x32xf32>
    %40 = vector.extract_strided_slice %37 {offsets = [0, 4, 0], sizes = [2, 16, 32], strides = [1, 1, 1]} : vector<2x20x32xf32> to vector<2x16x32xf32>
    %41 = tpu.concatenate %38, %39, %40 in 2 : vector<2x16x32xf32>, vector<2x16x32xf32>, vector<2x16x32xf32> -> vector<2x16x96xf32>
    %42 = vector.shape_cast %41 : vector<2x16x96xf32> to vector<32x96xf32>
    %cst_27 = arith.constant dense<0.000000e+00> : vector<32x32xf32>
    %43 = tpu.matmul %42, %2, %cst_27 {dimension_numbers = #tpu.dot_dimension_numbers<[1], [0], [0], [1], [0, 0, 1, 1], [], []>} : vector<32x96xf32>, vector<96x32xf32>, vector<32x32xf32> -> vector<32x32xf32>
    %cst_28 = arith.constant 0.000000e+00 : f32
    %44 = vector.broadcast %cst_28 : f32 to vector<32x32xf32>
    %45 = arith.cmpf ogt, %43, %44 : vector<32x32xf32>
    %cst_29 = arith.constant 0.00999999977 : f32
    %46 = vector.broadcast %cst_29 : f32 to vector<32x32xf32>
    %47 = arith.mulf %46, %43 : vector<32x32xf32>
    %48 = arith.select %45, %43, %47 : vector<32x32xi1>, vector<32x32xf32>
    %49 = arith.addf %48, %34 : vector<32x32xf32>
    %50 = vector.shape_cast %49 : vector<32x32xf32> to vector<2x16x32xf32>
    %cst_30 = arith.constant 0.000000e+00 : f32
    %51 = vector.broadcast %cst_30 : f32 to vector<2x2x32xf32>
    %52 = tpu.concatenate %51, %50, %51 in 1 : vector<2x2x32xf32>, vector<2x16x32xf32>, vector<2x2x32xf32> -> vector<2x20x32xf32>
    %53 = vector.extract_strided_slice %52 {offsets = [0, 0, 0], sizes = [2, 16, 32], strides = [1, 1, 1]} : vector<2x20x32xf32> to vector<2x16x32xf32>
    %54 = vector.extract_strided_slice %52 {offsets = [0, 2, 0], sizes = [2, 16, 32], strides = [1, 1, 1]} : vector<2x20x32xf32> to vector<2x16x32xf32>
    %55 = vector.extract_strided_slice %52 {offsets = [0, 4, 0], sizes = [2, 16, 32], strides = [1, 1, 1]} : vector<2x20x32xf32> to vector<2x16x32xf32>
    %56 = tpu.concatenate %53, %54, %55 in 2 : vector<2x16x32xf32>, vector<2x16x32xf32>, vector<2x16x32xf32> -> vector<2x16x96xf32>
    %57 = vector.shape_cast %56 : vector<2x16x96xf32> to vector<32x96xf32>
    %cst_31 = arith.constant dense<0.000000e+00> : vector<32x32xf32>
    %58 = tpu.matmul %57, %2, %cst_31 {dimension_numbers = #tpu.dot_dimension_numbers<[1], [0], [0], [1], [0, 0, 1, 1], [], []>} : vector<32x96xf32>, vector<96x32xf32>, vector<32x32xf32> -> vector<32x32xf32>
    %cst_32 = arith.constant 0.000000e+00 : f32
    %59 = vector.broadcast %cst_32 : f32 to vector<32x32xf32>
    %60 = arith.cmpf ogt, %58, %59 : vector<32x32xf32>
    %cst_33 = arith.constant 0.00999999977 : f32
    %61 = vector.broadcast %cst_33 : f32 to vector<32x32xf32>
    %62 = arith.mulf %61, %58 : vector<32x32xf32>
    %63 = arith.select %60, %58, %62 : vector<32x32xi1>, vector<32x32xf32>
    %64 = arith.addf %63, %49 : vector<32x32xf32>
    %65 = vector.shape_cast %64 : vector<32x32xf32> to vector<2x16x32xf32>
    %cst_34 = arith.constant 0.000000e+00 : f32
    %66 = vector.broadcast %cst_34 : f32 to vector<2x2x32xf32>
    %67 = tpu.concatenate %66, %65, %66 in 1 : vector<2x2x32xf32>, vector<2x16x32xf32>, vector<2x2x32xf32> -> vector<2x20x32xf32>
    %68 = vector.extract_strided_slice %67 {offsets = [0, 0, 0], sizes = [2, 16, 32], strides = [1, 1, 1]} : vector<2x20x32xf32> to vector<2x16x32xf32>
    %69 = vector.extract_strided_slice %67 {offsets = [0, 2, 0], sizes = [2, 16, 32], strides = [1, 1, 1]} : vector<2x20x32xf32> to vector<2x16x32xf32>
    %70 = vector.extract_strided_slice %67 {offsets = [0, 4, 0], sizes = [2, 16, 32], strides = [1, 1, 1]} : vector<2x20x32xf32> to vector<2x16x32xf32>
    %71 = tpu.concatenate %68, %69, %70 in 2 : vector<2x16x32xf32>, vector<2x16x32xf32>, vector<2x16x32xf32> -> vector<2x16x96xf32>
    %72 = vector.shape_cast %71 : vector<2x16x96xf32> to vector<32x96xf32>
    %cst_35 = arith.constant dense<0.000000e+00> : vector<32x32xf32>
    %73 = tpu.matmul %72, %2, %cst_35 {dimension_numbers = #tpu.dot_dimension_numbers<[1], [0], [0], [1], [0, 0, 1, 1], [], []>} : vector<32x96xf32>, vector<96x32xf32>, vector<32x32xf32> -> vector<32x32xf32>
    %cst_36 = arith.constant 0.000000e+00 : f32
    %74 = vector.broadcast %cst_36 : f32 to vector<32x32xf32>
    %75 = arith.cmpf ogt, %73, %74 : vector<32x32xf32>
    %cst_37 = arith.constant 0.00999999977 : f32
    %76 = vector.broadcast %cst_37 : f32 to vector<32x32xf32>
    %77 = arith.mulf %76, %73 : vector<32x32xf32>
    %78 = arith.select %75, %73, %77 : vector<32x32xi1>, vector<32x32xf32>
    %79 = arith.addf %78, %64 : vector<32x32xf32>
    %80 = vector.shape_cast %79 : vector<32x32xf32> to vector<2x16x32xf32>
    %cst_38 = arith.constant 0.000000e+00 : f32
    %81 = vector.broadcast %cst_38 : f32 to vector<2x2x32xf32>
    %82 = tpu.concatenate %81, %80, %81 in 1 : vector<2x2x32xf32>, vector<2x16x32xf32>, vector<2x2x32xf32> -> vector<2x20x32xf32>
    %83 = vector.extract_strided_slice %82 {offsets = [0, 0, 0], sizes = [2, 16, 32], strides = [1, 1, 1]} : vector<2x20x32xf32> to vector<2x16x32xf32>
    %84 = vector.extract_strided_slice %82 {offsets = [0, 2, 0], sizes = [2, 16, 32], strides = [1, 1, 1]} : vector<2x20x32xf32> to vector<2x16x32xf32>
    %85 = vector.extract_strided_slice %82 {offsets = [0, 4, 0], sizes = [2, 16, 32], strides = [1, 1, 1]} : vector<2x20x32xf32> to vector<2x16x32xf32>
    %86 = tpu.concatenate %83, %84, %85 in 2 : vector<2x16x32xf32>, vector<2x16x32xf32>, vector<2x16x32xf32> -> vector<2x16x96xf32>
    %87 = vector.shape_cast %86 : vector<2x16x96xf32> to vector<32x96xf32>
    %cst_39 = arith.constant dense<0.000000e+00> : vector<32x10xf32>
    %88 = tpu.matmul %87, %3, %cst_39 {dimension_numbers = #tpu.dot_dimension_numbers<[1], [0], [0], [1], [0, 0, 1, 1], [], []>} : vector<32x96xf32>, vector<96x10xf32>, vector<32x10xf32> -> vector<32x10xf32>
    %cst_40 = arith.constant 0.000000e+00 : f32
    %89 = vector.broadcast %cst_40 : f32 to vector<32x10xf32>
    %90 = arith.cmpf ogt, %88, %89 : vector<32x10xf32>
    %cst_41 = arith.constant 0.00999999977 : f32
    %91 = vector.broadcast %cst_41 : f32 to vector<32x10xf32>
    %92 = arith.mulf %91, %88 : vector<32x10xf32>
    %93 = arith.select %90, %88, %92 : vector<32x10xi1>, vector<32x10xf32>
    %94 = vector.shape_cast %93 : vector<32x10xf32> to vector<2x16x10xf32>
    %95 = vector.extract_strided_slice %94 {offsets = [0, 0, 0], sizes = [2, 1, 10], strides = [1, 1, 1]} : vector<2x16x10xf32> to vector<2x1x10xf32>
    %96 = vector.shape_cast %95 : vector<2x1x10xf32> to vector<2x10xf32>
    %97 = vector.extract_strided_slice %94 {offsets = [0, 1, 0], sizes = [2, 1, 10], strides = [1, 1, 1]} : vector<2x16x10xf32> to vector<2x1x10xf32>
    %98 = vector.shape_cast %97 : vector<2x1x10xf32> to vector<2x10xf32>
    %99 = vector.extract_strided_slice %94 {offsets = [0, 2, 0], sizes = [2, 1, 10], strides = [1, 1, 1]} : vector<2x16x10xf32> to vector<2x1x10xf32>
    %100 = vector.shape_cast %99 : vector<2x1x10xf32> to vector<2x10xf32>
    %101 = vector.extract_strided_slice %94 {offsets = [0, 3, 0], sizes = [2, 1, 10], strides = [1, 1, 1]} : vector<2x16x10xf32> to vector<2x1x10xf32>
    %102 = vector.shape_cast %101 : vector<2x1x10xf32> to vector<2x10xf32>
    %103 = vector.extract_strided_slice %94 {offsets = [0, 4, 0], sizes = [2, 1, 10], strides = [1, 1, 1]} : vector<2x16x10xf32> to vector<2x1x10xf32>
    %104 = vector.shape_cast %103 : vector<2x1x10xf32> to vector<2x10xf32>
    %105 = vector.extract_strided_slice %94 {offsets = [0, 5, 0], sizes = [2, 1, 10], strides = [1, 1, 1]} : vector<2x16x10xf32> to vector<2x1x10xf32>
    %106 = vector.shape_cast %105 : vector<2x1x10xf32> to vector<2x10xf32>
    %107 = vector.extract_strided_slice %94 {offsets = [0, 6, 0], sizes = [2, 1, 10], strides = [1, 1, 1]} : vector<2x16x10xf32> to vector<2x1x10xf32>
    %108 = vector.shape_cast %107 : vector<2x1x10xf32> to vector<2x10xf32>
    %109 = vector.extract_strided_slice %94 {offsets = [0, 7, 0], sizes = [2, 1, 10], strides = [1, 1, 1]} : vector<2x16x10xf32> to vector<2x1x10xf32>
    %110 = vector.shape_cast %109 : vector<2x1x10xf32> to vector<2x10xf32>
    %111 = vector.extract_strided_slice %94 {offsets = [0, 8, 0], sizes = [2, 1, 10], strides = [1, 1, 1]} : vector<2x16x10xf32> to vector<2x1x10xf32>
    %112 = vector.shape_cast %111 : vector<2x1x10xf32> to vector<2x10xf32>
    %113 = vector.extract_strided_slice %94 {offsets = [0, 9, 0], sizes = [2, 1, 10], strides = [1, 1, 1]} : vector<2x16x10xf32> to vector<2x1x10xf32>
    %114 = vector.shape_cast %113 : vector<2x1x10xf32> to vector<2x10xf32>
    %115 = vector.extract_strided_slice %94 {offsets = [0, 10, 0], sizes = [2, 1, 10], strides = [1, 1, 1]} : vector<2x16x10xf32> to vector<2x1x10xf32>
    %116 = vector.shape_cast %115 : vector<2x1x10xf32> to vector<2x10xf32>
    %117 = vector.extract_strided_slice %94 {offsets = [0, 11, 0], sizes = [2, 1, 10], strides = [1, 1, 1]} : vector<2x16x10xf32> to vector<2x1x10xf32>
    %118 = vector.shape_cast %117 : vector<2x1x10xf32> to vector<2x10xf32>
    %119 = vector.extract_strided_slice %94 {offsets = [0, 12, 0], sizes = [2, 1, 10], strides = [1, 1, 1]} : vector<2x16x10xf32> to vector<2x1x10xf32>
    %120 = vector.shape_cast %119 : vector<2x1x10xf32> to vector<2x10xf32>
    %121 = vector.extract_strided_slice %94 {offsets = [0, 13, 0], sizes = [2, 1, 10], strides = [1, 1, 1]} : vector<2x16x10xf32> to vector<2x1x10xf32>
    %122 = vector.shape_cast %121 : vector<2x1x10xf32> to vector<2x10xf32>
    %123 = vector.extract_strided_slice %94 {offsets = [0, 14, 0], sizes = [2, 1, 10], strides = [1, 1, 1]} : vector<2x16x10xf32> to vector<2x1x10xf32>
    %124 = vector.shape_cast %123 : vector<2x1x10xf32> to vector<2x10xf32>
    %125 = vector.extract_strided_slice %94 {offsets = [0, 15, 0], sizes = [2, 1, 10], strides = [1, 1, 1]} : vector<2x16x10xf32> to vector<2x1x10xf32>
    %126 = vector.shape_cast %125 : vector<2x1x10xf32> to vector<2x10xf32>
    %127 = tpu.concatenate %96, %98, %100, %102, %104, %106, %108, %110, %112, %114, %116, %118, %120, %122, %124, %126 in 1 : vector<2x10xf32>, vector<2x10xf32>, vector<2x10xf32>, vector<2x10xf32>, vector<2x10xf32>, vector<2x10xf32>, vector<2x10xf32>, vector<2x10xf32>, vector<2x10xf32>, vector<2x10xf32>, vector<2x10xf32>, vector<2x10xf32>, vector<2x10xf32>, vector<2x10xf32>, vector<2x10xf32>, vector<2x10xf32> -> vector<2x160xf32>
    %cst_42 = arith.constant dense<0.000000e+00> : vector<2x32xf32>
    %128 = tpu.matmul %127, %4, %cst_42 {dimension_numbers = #tpu.dot_dimension_numbers<[1], [0], [0], [1], [0, 0, 1, 1], [], []>} : vector<2x160xf32>, vector<160x32xf32>, vector<2x32xf32> -> vector<2x32xf32>
    %129 = vector.broadcast %5 : vector<1x32xf32> to vector<2x32xf32>
    %130 = arith.addf %128, %129 : vector<2x32xf32>
    %cst_43 = arith.constant 0.000000e+00 : f32
    %131 = vector.broadcast %cst_43 : f32 to vector<2x32xf32>
    %132 = arith.cmpf ogt, %130, %131 : vector<2x32xf32>
    %cst_44 = arith.constant 0.00999999977 : f32
    %133 = vector.broadcast %cst_44 : f32 to vector<2x32xf32>
    %134 = arith.mulf %133, %130 : vector<2x32xf32>
    %135 = arith.select %132, %130, %134 : vector<2x32xi1>, vector<2x32xf32>
    %cst_45 = arith.constant dense<0.000000e+00> : vector<2x32xf32>
    %136 = tpu.matmul %135, %6, %cst_45 {dimension_numbers = #tpu.dot_dimension_numbers<[1], [0], [0], [1], [0, 0, 1, 1], [], []>} : vector<2x32xf32>, vector<32x32xf32>, vector<2x32xf32> -> vector<2x32xf32>
    %137 = vector.broadcast %7 : vector<1x32xf32> to vector<2x32xf32>
    %138 = arith.addf %136, %137 : vector<2x32xf32>
    %cst_46 = arith.constant 0.000000e+00 : f32
    %139 = vector.broadcast %cst_46 : f32 to vector<2x32xf32>
    %140 = arith.cmpf ogt, %138, %139 : vector<2x32xf32>
    %cst_47 = arith.constant 0.00999999977 : f32
    %141 = vector.broadcast %cst_47 : f32 to vector<2x32xf32>
    %142 = arith.mulf %141, %138 : vector<2x32xf32>
    %143 = arith.select %140, %138, %142 : vector<2x32xi1>, vector<2x32xf32>
    %144 = arith.addf %143, %135 : vector<2x32xf32>
    %cst_48 = arith.constant dense<0.000000e+00> : vector<2x32xf32>
    %145 = tpu.matmul %144, %6, %cst_48 {dimension_numbers = #tpu.dot_dimension_numbers<[1], [0], [0], [1], [0, 0, 1, 1], [], []>} : vector<2x32xf32>, vector<32x32xf32>, vector<2x32xf32> -> vector<2x32xf32>
    %146 = vector.broadcast %7 : vector<1x32xf32> to vector<2x32xf32>
    %147 = arith.addf %145, %146 : vector<2x32xf32>
    %cst_49 = arith.constant 0.000000e+00 : f32
    %148 = vector.broadcast %cst_49 : f32 to vector<2x32xf32>
    %149 = arith.cmpf ogt, %147, %148 : vector<2x32xf32>
    %cst_50 = arith.constant 0.00999999977 : f32
    %150 = vector.broadcast %cst_50 : f32 to vector<2x32xf32>
    %151 = arith.mulf %150, %147 : vector<2x32xf32>
    %152 = arith.select %149, %147, %151 : vector<2x32xi1>, vector<2x32xf32>
    %153 = arith.addf %152, %144 : vector<2x32xf32>
    %cst_51 = arith.constant dense<0.000000e+00> : vector<2x32xf32>
    %154 = tpu.matmul %153, %6, %cst_51 {dimension_numbers = #tpu.dot_dimension_numbers<[1], [0], [0], [1], [0, 0, 1, 1], [], []>} : vector<2x32xf32>, vector<32x32xf32>, vector<2x32xf32> -> vector<2x32xf32>
    %155 = vector.broadcast %7 : vector<1x32xf32> to vector<2x32xf32>
    %156 = arith.addf %154, %155 : vector<2x32xf32>
    %cst_52 = arith.constant 0.000000e+00 : f32
    %157 = vector.broadcast %cst_52 : f32 to vector<2x32xf32>
    %158 = arith.cmpf ogt, %156, %157 : vector<2x32xf32>
    %cst_53 = arith.constant 0.00999999977 : f32
    %159 = vector.broadcast %cst_53 : f32 to vector<2x32xf32>
    %160 = arith.mulf %159, %156 : vector<2x32xf32>
    %161 = arith.select %158, %156, %160 : vector<2x32xi1>, vector<2x32xf32>
    %162 = arith.addf %161, %153 : vector<2x32xf32>
    %cst_54 = arith.constant dense<0.000000e+00> : vector<2x12xf32>
    %163 = tpu.matmul %162, %8, %cst_54 {dimension_numbers = #tpu.dot_dimension_numbers<[1], [0], [0], [1], [0, 0, 1, 1], [], []>} : vector<2x32xf32>, vector<32x12xf32>, vector<2x12xf32> -> vector<2x12xf32>
    %164 = vector.broadcast %9 : vector<1x12xf32> to vector<2x12xf32>
    %165 = arith.addf %163, %164 : vector<2x12xf32>
    %c0_55 = arith.constant 0 : index
    %c0_56 = arith.constant 0 : index
    %166 = vector.load %arg11[%c0_55, %c0_56] : memref<2x12xf32, #tpu.memory_space<vmem>>, vector<2x12xf32>
    tpu.vector_store %arg11[%c0_55, %c0_56], %165 {strides = array<i32>} : memref<2x12xf32, #tpu.memory_space<vmem>>, vector<2x12xf32>,
    return
  }
}

</mosaic_0001>

<bundles_post_ra>
// kernel: tpu_custom_call.1
= control target key start
LH: loop header
LB: loop body
LE: loop exit
PB: predicated region body
PF: predicated region fallthrough
CT: control target
= control target key end

     0   :  { %v1256_v2 = vmov 0   ;;  %s1888_s0 = inlined_call_operand.vmem [shape: f32[32,1], index: 0, kind: input, shape index: {}]   ;;  %s1889_s1 = inlined_call_operand.vmem [shape: f32[1,32], index: 1, kind: input, shape index: {}]   ;;  %s1890_s2 = inlined_call_operand.vmem [shape: f32[160,32], index: 2, kind: input, shape index: {}]   ;;  %s1891_s3 = inlined_call_operand.vmem [shape: f32[96,32], index: 3, kind: input, shape index: {}]   ;;  %s1892_s4 = inlined_call_operand.vmem [shape: f32[96,10], index: 4, kind: input, shape index: {}]   ;;  %s1893_s5 = inlined_call_operand.vmem [shape: f32[160,32], index: 5, kind: input, shape index: {}]   ;;  %s1894_s6 = inlined_call_operand.vmem [shape: f32[1,32], index: 6, kind: input, shape index: {}]   ;;  %s1895_s7 = inlined_call_operand.vmem [shape: f32[32,32], index: 7, kind: input, shape index: {}]   ;;  %s1896_s8 = inlined_call_operand.vmem [shape: f32[1,32], index: 8, kind: input, shape index: {}]   ;;  %s1897_s9 = inlined_call_operand.vmem [shape: f32[32,12], index: 9, kind: input, shape index: {}]   ;;  %s1898_s10 = inlined_call_operand.vmem [shape: f32[1,12], index: 10, kind: input, shape index: {}]   ;;  %s1899_s11 = inlined_call_operand.hbm [shape: f32[2,12], index: 11, kind: output, shape index: {}]  }
   0x1   :  { %v115_v0 = vld [vmem:[%s1888_s0] sm:$0xff]  ;;  %v117_v1 = vld [vmem:[%s1888_s0 + $0x10] sm:$0xff]  ;;  %1219 = vset.pattern.permute.xlu0 %v1256_v2  ;;  %1220 = vset.pattern.permute.xlu1 %v1256_v2 }
   0x2   :  { %121 = vperm.xlu0 %1219, %v115_v0   ;;  %131 = vperm.xlu1 %1220, %v117_v1  }
   0x3   :  { %16 = vsyncpa [#allocation3], 0  ;;  %v116_v3 = vld [vmem:[%s1888_s0 + $0x8] sm:$0xff]  ;;  %v118_v4 = vld [vmem:[%s1888_s0 + $0x18] sm:$0xff]  ;;  %vm162_vm1 = vcmask 1043456   ;;  %vm251_vm5 = vcmask 261120  }
   0x4   :  { %v59_v5 = vld [vmem:[%s1890_s2 + $0x98] sm:$0xff]  ;;  %v58_v6 = vld [vmem:[%s1890_s2 + $0x90] sm:$0xff]  ;;  %v57_v7 = vld [vmem:[%s1890_s2 + $0x88] sm:$0xff]  ;;  %vm228_vm6 = vcmask 1041408   ;;  %vm183_vm7 = vcmask 1045504   ;;  %s1258_s15 = smov 64  }
   0x5   :  { %315 = vmatpush.msra.mxu1 %v59_v5  ;;  %v56_v8 = vld [vmem:[%s1890_s2 + $0x80] sm:$0xff]  ;;  %s1259_s16 = smov 32   ;;  %v55_v51 = vld [vmem:[%s1890_s2 + $0x78] sm:$0xff]  ;;  %v54_v52 = vld [vmem:[%s1890_s2 + $0x70] sm:$0xff]  ;;  %vm256_vm8 = vcmask 523264   ;;  %vm261_vm9 = vcmask 785408  }
   0x6   :  { %v1226_v9 = vld [vmem:[%s1889_s1] ss:$0 sm:$0xff]  ;;  %s1257_s1 = smov 96   ;;  %274 = vmatpush.msra.mxu0 %v55_v51  ;;  %v53_v53 = vld [vmem:[%s1890_s2 + $0x68] sm:$0xff]  ;;  %s1261_s0 = smov 30  }
   0x7   :  { %316 = vmatpush.msra.mxu1 %v58_v6  ;;  %v52_v58 = vld [vmem:[%s1890_s2 + $0x60] sm:$0xff]  ;;  %s1262_s14 = smov 20   ;;  %s1264_s17 = smov 60  }
   0x8   :  { %275 = vmatpush.msra.mxu0 %v54_v52  ;;  %s1265_s18 = smov 50   ;;  %s1266_s19 = smov 70  }
   0x9   :  { %317 = vmatpush.msra.mxu1 %v57_v7  ;;  %v51_v7 = vld [vmem:[%s1890_s2 + $0x58] sm:$0xff]  ;;  %s1267_s20 = smov 90   ;;  %s1268_s21 = smov 80  }
   0xa   :  { %126 = vperm.xlu0 %1219, %v116_v3   ;;  %136 = vperm.xlu1 %1220, %v118_v4   ;;  %s1269_s22 = smov 100   ;;  %s1271_s23 = smov 110  }
   0xb   :  { %318 = vmatpush.msra.mxu1 %v56_v8  ;;  %276 = vmatpush.msra.mxu0 %v53_v53  ;;  %v50_v8 = vld [vmem:[%s1890_s2 + $0x50] sm:$0xff]  ;;  %s1273_s24 = smov 22   ;;  %s1274_s25 = smov 12  }
   0xd   :  { %277 = vmatpush.msra.mxu0 %v52_v58 }
   0xf   :  { %278 = vmatpush.msra.mxu0 %v51_v7 }
  0x11   :  { %279 = vmatpush.msra.mxu0 %v50_v8 }
  0x74   :  { %v122_v10 = vpop.permute.xlu0 %121  ;;  %v132_v11 = vpop.permute.xlu1 %131 }
  0x75   :  { %v142_v12 = vmul.f32 %v1226_v9, %v122_v10  ;;  %v144_v14 = vmul.f32 %v1226_v9, %v132_v11  ;;  %v48_v10 = vld [vmem:[%s1890_s2 + $0x40] sm:$0xff]  ;;  %v47_v11 = vld [vmem:[%s1890_s2 + $0x38] sm:$0xff] }
  0x77   :  { %vm146_vm0 = vcmp.gt.f32.partialorder %v142_v12, 0.0  ;;  %v150_v13 = vmul.f32 0.01, %v142_v12  ;;  %v152_v17 = vmul.f32 0.01, %v144_v14  ;;  %vm148_vm2 = vcmp.gt.f32.partialorder %v144_v14, 0.0 }
  0x79   :  { %v154_v15 = vsel %vm146_vm0, %v142_v12, %v150_v13  ;;  %v156_v25 = vsel %vm148_vm2, %v144_v14, %v152_v17  ;;  %v46_v12 = vld [vmem:[%s1890_s2 + $0x30] sm:$0xff]  ;;  %v45_v13 = vld [vmem:[%s1890_s2 + $0x28] sm:$0xff]  ;;  %v44_v14 = vld [vmem:[%s1890_s2 + $0x20] sm:$0xff] }
  0x7a   :  { %v163_v16 = vrot.slane %v154_v15, 4  ;;  %v166_v29 = vrot.slane %v156_v25, 4  ;;  %v43_v15 = vld [vmem:[%s1890_s2 + $0x18] sm:$0xff]  ;;  %v41_v17 = vld [vmem:[%s1890_s2 + $0x8] sm:$0xff] }
  0x7c   :  { %v127_v18 = vpop.permute.xlu0 %126  ;;  %v137_v19 = vpop.permute.xlu1 %136  ;;  %v1364_v24 = vsel %vm162_vm1, 0.0, %v163_v16  ;;  %v1381_v43 = vsel %vm162_vm1, 0.0, %v166_v29 }
  0x7d   :  { %v143_v20 = vmul.f32 %v1226_v9, %v127_v18  ;;  %v145_v21 = vmul.f32 %v1226_v9, %v137_v19  ;;  %v229_v30 = vrot.slane %v1364_v24, 6  ;;  %v184_v34 = vrot.slane %v1364_v24, 2  ;;  %v49_v9 = vld [vmem:[%s1890_s2 + $0x48] sm:$0xff]  ;;  %v40_v18 = vld [vmem:[%s1890_s2] sm:$0xff] }
  0x7e   :  { %v189_v47 = vrot.slane %v1381_v43, 2  ;;  %v211_v49 = vrot.slane %v1381_v43, 4  ;;  %v206_v57 = vrot.slane %v1364_v24, 4  ;;  %v234_v2 = vrot.slane %v1381_v43, 6  ;;  %280 = vmatpush.msra.mxu0 %v49_v9 }
  0x7f   :  { %vm147_vm3 = vcmp.gt.f32.partialorder %v143_v20, 0.0  ;;  %v151_v22 = vmul.f32 0.01, %v143_v20  ;;  %vm149_vm4 = vcmp.gt.f32.partialorder %v145_v21, 0.0  ;;  %v153_v23 = vmul.f32 0.01, %v145_v21 }
  0x80   :  { %281 = vmatpush.msra.mxu0 %v48_v10 }
  0x81   :  { %v155_v26 = vsel %vm147_vm3, %v143_v20, %v151_v22  ;;  %v157_v27 = vsel %vm149_vm4, %v145_v21, %v153_v23 }
  0x82   :  { %v164_v28 = vrot.slane %v155_v26, 4  ;;  %v167_v32 = vrot.slane %v157_v27, 4  ;;  %282 = vmatpush.msra.mxu0 %v47_v11 }
  0x84   :  { %v177_v31 = vsel %vm162_vm1, %v164_v28, 0.0  ;;  %v1369_v33 = vsel %vm162_vm1, %v163_v16, %v164_v28  ;;  %v1384_v44 = vsel %vm162_vm1, %v166_v29, %v167_v32  ;;  %v178_v56 = vsel %vm162_vm1, %v167_v32, 0.0  ;;  %283 = vmatpush.msra.mxu0 %v46_v12  ;;  %v42_v16 = vld [vmem:[%s1890_s2 + $0x10] sm:$0xff] }
  0x85   :  { %1174 = vmatmul.msk.f32.vlgmr.msra.gmra.mxu1 %vm251_vm5, %v1369_v33  ;;  %v230_v35 = vrot.slane %v1369_v33, 6  ;;  %v207_v36 = vrot.slane %v1369_v33, 4  ;;  %v209_v37 = vrot.slane %v177_v31, 4  ;;  %v185_v38 = vrot.slane %v1369_v33, 2 }
  0x86   :  { %v187_v39 = vrot.slane %v177_v31, 2  ;;  %v190_v48 = vrot.slane %v1384_v44, 2  ;;  %v212_v50 = vrot.slane %v1384_v44, 4  ;;  %v192_v60 = vrot.slane %v178_v56, 2  ;;  %284 = vmatpush.msra.mxu0 %v45_v13 }
  0x87   :  { %v231_v40 = vsel %vm228_vm6, %v229_v30, %v230_v35  ;;  %v210_v41 = vsel %vm162_vm1, %v207_v36, %v209_v37  ;;  %v186_v42 = vsel %vm183_vm7, %v184_v34, %v185_v38  ;;  %v208_v59 = vsel %vm162_vm1, %v206_v57, %v207_v36 }
  0x88   :  { %239 = vrot.lane.b32.xlu0 %v231_v40, %s1257_s1  ;;  %218 = vrot.lane.b32.xlu1 %v210_v41, %s1258_s15  ;;  %v188_v45 = vsel %vm183_vm7, %v185_v38, %v187_v39  ;;  %v191_v54 = vsel %vm183_vm7, %v189_v47, %v190_v48  ;;  %v213_v55 = vsel %vm162_vm1, %v211_v49, %v212_v50  ;;  %v214_v61 = vrot.slane %v178_v56, 4 }
  0x89   :  { %v1221_v46 = vpack.i.bf16 %v188_v45, %v186_v42  ;;  %v232_v62 = vrot.slane %v177_v31, 6  ;;  %v193_v63 = vsel %vm183_vm7, %v190_v48, %v192_v60  ;;  %v235_v3 = vrot.slane %v1384_v44, 6  ;;  %285 = vmatpush.msra.mxu0 %v44_v14 }
  0x8a   :  { %v215_v0 = vsel %vm162_vm1, %v212_v50, %v214_v61  ;;  %v237_v5 = vrot.slane %v178_v56, 6 }
  0x8b   :  { %1222 = vrot.lane.b32.xlu2 %v1221_v46, %s1259_s16  ;;  %v233_v1 = vsel %vm228_vm6, %v230_v35, %v232_v62  ;;  %v236_v4 = vsel %vm228_vm6, %v234_v2, %v235_v3  ;;  %286 = vmatpush.msra.mxu0 %v43_v15 }
  0x8c   :  { %v238_v6 = vsel %vm228_vm6, %v235_v3, %v237_v5 }
  0x8d   :  { %1175 = vmatmul.msk.f32.gmra.mxu1 %vm251_vm5, %v177_v31  ;;  %287 = vmatpush.msra.mxu0 %v42_v16 }
  0x8f   :  { %288 = vmatpush.msra.mxu0 %v41_v17 }
  0x90   :  { %198 = vrot.lane.b32.xlu0 %v191_v54, %s1259_s16  ;;  %220 = vrot.lane.b32.xlu1 %v213_v55, %s1258_s15 }
  0x91   :  { %289 = vmatpush.msra.mxu0 %v40_v18 }
  0x93   :  { %216 = vrot.lane.b32.xlu2 %v208_v59, %s1258_s15 }
  0x95   :  { %1176 = vmatmul.msk.f32.gmra.mxu1 %vm251_vm5, %v1384_v44 }
  0x98   :  { %200 = vrot.lane.b32.xlu0 %v193_v63, %s1259_s16  ;;  %222 = vrot.lane.b32.xlu1 %v215_v0, %s1258_s15 }
  0x9b   :  { %241 = vrot.lane.b32.xlu2 %v233_v1, %s1257_s1 }
  0x9d   :  { %1177 = vmatmul.msk.f32.gmra.mxu1 %vm251_vm5, %v178_v56 }
  0xa3   :  { %243 = vrot.lane.b32.xlu2 %v236_v4, %s1257_s1 }
  0xab   :  { %245 = vrot.lane.b32.xlu2 %v238_v6, %s1257_s1  ;;  %s1263_s1 = smov 40  }
  0xe5   :  { %v1223_v19 = vpop.permute.xlu2 %1222 }
  0xe6   :  { %v1224_v21 = vunpack.i.l.bf16 %v1223_v19  ;;  %v1225_v27 = vunpack.i.h.bf16 %v1223_v19 }
  0xe8   :  { %v252_v22 = vsel %vm251_vm5, %v1364_v24, %v1224_v21  ;;  %v253_v30 = vsel %vm251_vm5, %v1369_v33, %v1225_v27 }
  0xed   :  { %v217_v20 = vpop.permute.xlu2 %216 }
  0xee   :  { %v257_v23 = vsel %vm256_vm8, %v252_v22, %v217_v20 }
  0xf5   :  { %v242_v29 = vpop.permute.xlu2 %241 }
  0xfa   :  { %v240_v25 = vpop.permute.xlu0 %239  ;;  %v219_v26 = vpop.permute.xlu1 %218 }
  0xfb   :  { %v262_v28 = vsel %vm261_vm9, %v257_v23, %v240_v25  ;;  %v258_v31 = vsel %vm256_vm8, %v253_v30, %v219_v26 }
  0xfc   :  { %290 = vmatmul.f32.vlgmr.msra.gmra.mxu0 %v262_v28  ;;  %v263_v35 = vsel %vm261_vm9, %v258_v31, %v242_v29  ;;  %v71_v31 = vld [vmem:[%s1891_s3 + $0x58] sm:$0xff] }
  0xfd   :  { %v244_v36 = vpop.permute.xlu2 %243  ;;  %436 = vmatpush.msra.mxu2 %v71_v31  ;;  %569 = vmatpush.msra.mxu3 %v71_v31 }
  0xfe   :  { %702 = vmatpush.msrb.mxu1 %v71_v31 }
 0x102   :  { %v199_v32 = vpop.permute.xlu0 %198  ;;  %v221_v34 = vpop.permute.xlu1 %220 }
 0x103   :  { %v254_v24 = vsel %vm251_vm5, %v1381_v43, %v199_v32  ;;  %v320_v46 = vpop.f32.mrf.mxu1  ;;  %v70_v32 = vld [vmem:[%s1891_s3 + $0x50] sm:$0xff] }
 0x104   :  { %293 = vmatmul.f32.gmra.mxu0 %v263_v35  ;;  %v259_v37 = vsel %vm256_vm8, %v254_v24, %v221_v34  ;;  %v69_v34 = vld [vmem:[%s1891_s3 + $0x48] sm:$0xff]  ;;  %437 = vmatpush.msra.mxu2 %v70_v32  ;;  %v68_v35 = vld [vmem:[%s1891_s3 + $0x40] sm:$0xff]  ;;  %v67_v24 = vld [vmem:[%s1891_s3 + $0x38] sm:$0xff] }
 0x105   :  { %v264_v39 = vsel %vm261_vm9, %v259_v37, %v244_v36  ;;  %v246_v42 = vpop.permute.xlu2 %245  ;;  %570 = vmatpush.msra.mxu3 %v70_v32  ;;  %703 = vmatpush.msrb.mxu1 %v70_v32  ;;  %v66_v36 = vld [vmem:[%s1891_s3 + $0x30] sm:$0xff]  ;;  %v65_v37 = vld [vmem:[%s1891_s3 + $0x28] sm:$0xff] }
 0x106   :  { %438 = vmatpush.msra.mxu2 %v69_v34 }
 0x107   :  { %571 = vmatpush.msra.mxu3 %v69_v34  ;;  %704 = vmatpush.msrb.mxu1 %v69_v34 }
 0x108   :  { %439 = vmatpush.msra.mxu2 %v68_v35 }
 0x109   :  { %572 = vmatpush.msra.mxu3 %v68_v35  ;;  %705 = vmatpush.msrb.mxu1 %v68_v35 }
 0x10a   :  { %v201_v38 = vpop.permute.xlu0 %200  ;;  %v223_v40 = vpop.permute.xlu1 %222  ;;  %440 = vmatpush.msra.mxu2 %v67_v24 }
 0x10b   :  { %v255_v33 = vsel %vm251_vm5, %v1384_v44, %v201_v38  ;;  %v323_v49 = vpop.f32.mrf.mxu1  ;;  %573 = vmatpush.msra.mxu3 %v67_v24  ;;  %706 = vmatpush.msrb.mxu1 %v67_v24  ;;  %v64_v38 = vld [vmem:[%s1891_s3 + $0x20] sm:$0xff] }
 0x10c   :  { %296 = vmatmul.f32.gmra.mxu0 %v264_v39  ;;  %v260_v41 = vsel %vm256_vm8, %v255_v33, %v223_v40  ;;  %441 = vmatpush.msra.mxu2 %v66_v36  ;;  %v63_v39 = vld [vmem:[%s1891_s3 + $0x18] sm:$0xff]  ;;  %v62_v33 = vld [vmem:[%s1891_s3 + $0x10] sm:$0xff]  ;;  %v61_v40 = vld [vmem:[%s1891_s3 + $0x8] sm:$0xff] }
 0x10d   :  { %v265_v45 = vsel %vm261_vm9, %v260_v41, %v246_v42  ;;  %574 = vmatpush.msra.mxu3 %v66_v36  ;;  %707 = vmatpush.msrb.mxu1 %v66_v36  ;;  %v60_v41 = vld [vmem:[%s1891_s3] sm:$0xff] }
 0x10e   :  { %442 = vmatpush.msra.mxu2 %v65_v37 }
 0x10f   :  { %575 = vmatpush.msra.mxu3 %v65_v37  ;;  %708 = vmatpush.msrb.mxu1 %v65_v37 }
 0x110   :  { %443 = vmatpush.msra.mxu2 %v64_v38 }
 0x111   :  { %576 = vmatpush.msra.mxu3 %v64_v38  ;;  %709 = vmatpush.msrb.mxu1 %v64_v38 }
 0x112   :  { %444 = vmatpush.msra.mxu2 %v63_v39 }
 0x113   :  { %v326_v56 = vpop.f32.mrf.mxu1  ;;  %577 = vmatpush.msra.mxu3 %v63_v39  ;;  %710 = vmatpush.msrb.mxu1 %v63_v39 }
 0x114   :  { %299 = vmatmul.f32.gmra.mxu0 %v265_v45  ;;  %445 = vmatpush.msra.mxu2 %v62_v33 }
 0x115   :  { %578 = vmatpush.msra.mxu3 %v62_v33  ;;  %711 = vmatpush.msrb.mxu1 %v62_v33 }
 0x116   :  { %446 = vmatpush.msra.mxu2 %v61_v40 }
 0x117   :  { %579 = vmatpush.msra.mxu3 %v61_v40  ;;  %712 = vmatpush.msrb.mxu1 %v61_v40 }
 0x118   :  { %447 = vmatpush.msra.mxu2 %v60_v41 }
 0x119   :  { %580 = vmatpush.msra.mxu3 %v60_v41  ;;  %713 = vmatpush.msrb.mxu1 %v60_v41 }
 0x11b   :  { %v329_v8 = vpop.f32.mrf.mxu1 }
 0x179   :  { %v291_v47 = vpop.f32.mrf.mxu0 }
 0x17a   :  { %v321_v43 = vadd.f32 %v320_v46, %v291_v47 }
 0x17c   :  { %vm332_vm10 = vcmp.gt.f32.partialorder %v321_v43, 0.0  ;;  %v336_v48 = vmul.f32 0.01, %v321_v43 }
 0x17e   :  { %v1482_v50 = vsel %vm332_vm10, %v321_v43, %v336_v48 }
 0x17f   :  { %v348_v52 = vrot.slane %v1482_v50, 6 }
 0x181   :  { %v294_v51 = vpop.f32.mrf.mxu0  ;;  %v1486_v54 = vsel %vm228_vm6, 0.0, %v348_v52 }
 0x182   :  { %v324_v53 = vadd.f32 %v323_v49, %v294_v51  ;;  %v390_v60 = vrot.slane %v1486_v54, 4  ;;  %v368_v2 = vrot.slane %v1486_v54, 2 }
 0x184   :  { %vm333_vm11 = vcmp.gt.f32.partialorder %v324_v53, 0.0  ;;  %v337_v44 = vmul.f32 0.01, %v324_v53 }
 0x186   :  { %v1488_v55 = vsel %vm333_vm11, %v324_v53, %v337_v44 }
 0x187   :  { %v349_v57 = vrot.slane %v1488_v55, 6 }
 0x189   :  { %v297_v58 = vpop.f32.mrf.mxu0  ;;  %v1492_v59 = vsel %vm228_vm6, %v348_v52, %v349_v57  ;;  %v362_v61 = vsel %vm228_vm6, %v349_v57, 0.0 }
 0x18a   :  { %v327_v62 = vadd.f32 %v326_v56, %v297_v58  ;;  %v391_v63 = vrot.slane %v1492_v59, 4  ;;  %v369_v0 = vrot.slane %v1492_v59, 2  ;;  %v371_v1 = vrot.slane %v362_v61, 2 }
 0x18b   :  { %v393_v10 = vrot.slane %v362_v61, 4 }
 0x18c   :  { %vm334_vm12 = vcmp.gt.f32.partialorder %v327_v62, 0.0  ;;  %v338_v3 = vmul.f32 0.01, %v327_v62  ;;  %v392_v4 = vsel %vm162_vm1, %v390_v60, %v391_v63  ;;  %v372_v5 = vsel %vm183_vm7, %v369_v0, %v371_v1 }
 0x18d   :  { %400 = vrot.lane.b32.xlu1 %v392_v4, %s1258_s15  ;;  %380 = vrot.lane.b32.xlu2 %v372_v5, %s1259_s16  ;;  %v370_v6 = vsel %vm183_vm7, %v368_v2, %v369_v0  ;;  %v394_v14 = vsel %vm162_vm1, %v391_v63, %v393_v10 }
 0x18e   :  { %378 = vrot.lane.b32.xlu0 %v370_v6, %s1259_s16  ;;  %v1505_v7 = vsel %vm334_vm12, %v327_v62, %v338_v3 }
 0x18f   :  { %v351_v11 = vrot.slane %v1505_v7, 6 }
 0x191   :  { %v300_v9 = vpop.f32.mrf.mxu0  ;;  %v1510_v15 = vsel %vm228_vm6, 0.0, %v351_v11 }
 0x192   :  { %v330_v12 = vadd.f32 %v329_v8, %v300_v9  ;;  %v395_v19 = vrot.slane %v1510_v15, 4  ;;  %v373_v25 = vrot.slane %v1510_v15, 2 }
 0x194   :  { %vm335_vm13 = vcmp.gt.f32.partialorder %v330_v12, 0.0  ;;  %v339_v13 = vmul.f32 0.01, %v330_v12 }
 0x196   :  { %v1512_v16 = vsel %vm335_vm13, %v330_v12, %v339_v13  ;;  %402 = vrot.lane.b32.xlu0 %v394_v14, %s1258_s15 }
 0x197   :  { %v352_v17 = vrot.slane %v1512_v16, 6 }
 0x199   :  { %v1517_v18 = vsel %vm228_vm6, %v351_v11, %v352_v17  ;;  %v363_v20 = vsel %vm228_vm6, %v352_v17, 0.0 }
 0x19a   :  { %v396_v21 = vrot.slane %v1517_v18, 4  ;;  %v374_v22 = vrot.slane %v1517_v18, 2  ;;  %v376_v23 = vrot.slane %v363_v20, 2  ;;  %v398_v29 = vrot.slane %v363_v20, 4 }
 0x19c   :  { %v397_v26 = vsel %vm162_vm1, %v395_v19, %v396_v21  ;;  %v377_v27 = vsel %vm183_vm7, %v374_v22, %v376_v23  ;;  %v375_v28 = vsel %vm183_vm7, %v373_v25, %v374_v22  ;;  %v399_v30 = vsel %vm162_vm1, %v396_v21, %v398_v29 }
 0x19d   :  { %404 = vrot.lane.b32.xlu2 %v397_v26, %s1258_s15  ;;  %382 = vrot.lane.b32.xlu1 %v375_v28, %s1259_s16 }
 0x19e   :  { %384 = vrot.lane.b32.xlu0 %v377_v27, %s1259_s16 }
 0x1a5   :  { %406 = vrot.lane.b32.xlu1 %v399_v30, %s1258_s15 }
 0x1e7   :  { %v381_v43 = vpop.permute.xlu2 %380 }
 0x1e8   :  { %v413_v48 = vsel %vm251_vm5, %v1492_v59, %v381_v43 }
 0x1f7   :  { %v405_v53 = vpop.permute.xlu2 %404 }
 0x1ff   :  { %v401_v42 = vpop.permute.xlu1 %400 }
 0x200   :  { %v379_v45 = vpop.permute.xlu0 %378 }
 0x201   :  { %v412_v46 = vsel %vm251_vm5, %v1486_v54, %v379_v45 }
 0x202   :  { %v416_v47 = vsel %vm256_vm8, %v412_v46, %v401_v42 }
 0x203   :  { %1178 = vmatmul.msk.f32.vlgmr.msra.gmra.mxu2 %vm261_vm9, %v416_v47 }
 0x208   :  { %v403_v49 = vpop.permute.xlu0 %402 }
 0x209   :  { %v417_v51 = vsel %vm256_vm8, %v413_v48, %v403_v49 }
 0x20b   :  { %1179 = vmatmul.msk.f32.gmra.mxu2 %vm261_vm9, %v417_v51 }
 0x20f   :  { %v383_v52 = vpop.permute.xlu1 %382 }
 0x210   :  { %v414_v44 = vsel %vm251_vm5, %v1510_v15, %v383_v52  ;;  %v385_v56 = vpop.permute.xlu0 %384 }
 0x211   :  { %v418_v54 = vsel %vm256_vm8, %v414_v44, %v405_v53  ;;  %v415_v57 = vsel %vm251_vm5, %v1517_v18, %v385_v56 }
 0x213   :  { %1180 = vmatmul.msk.f32.gmra.mxu2 %vm261_vm9, %v418_v54 }
 0x217   :  { %v407_v58 = vpop.permute.xlu1 %406 }
 0x218   :  { %v419_v59 = vsel %vm256_vm8, %v415_v57, %v407_v58 }
 0x21b   :  { %1181 = vmatmul.msk.f32.gmra.mxu2 %vm261_vm9, %v419_v59 }
 0x286   :  { %v449_v60 = vpop.f32.mrf.mxu2 }
 0x287   :  { %vm461_vm14 = vcmp.gt.f32.partialorder %v449_v60, 0.0  ;;  %v465_v61 = vmul.f32 0.01, %v449_v60 }
 0x289   :  { %v469_v62 = vsel %vm461_vm14, %v449_v60, %v465_v61 }
 0x28a   :  { %v1585_v63 = vadd.f32 %v469_v62, %v1482_v50 }
 0x28c   :  { %v481_v1 = vrot.slane %v1585_v63, 6 }
 0x28e   :  { %v452_v0 = vpop.f32.mrf.mxu2  ;;  %v493_v5 = vsel %vm228_vm6, 0.0, %v481_v1 }
 0x28f   :  { %vm462_vm15 = vcmp.gt.f32.partialorder %v452_v0, 0.0  ;;  %v466_v2 = vmul.f32 0.01, %v452_v0  ;;  %v501_v10 = vrot.slane %v493_v5, 2  ;;  %v523_v11 = vrot.slane %v493_v5, 4 }
 0x291   :  { %v470_v3 = vsel %vm462_vm15, %v452_v0, %v466_v2 }
 0x292   :  { %v1589_v4 = vadd.f32 %v470_v3, %v1488_v55 }
 0x294   :  { %v482_v6 = vrot.slane %v1589_v4, 6 }
 0x296   :  { %v455_v8 = vpop.f32.mrf.mxu2  ;;  %v483_v9 = vsel %vm228_vm6, %v481_v1, %v482_v6  ;;  %v495_v50 = vsel %vm228_vm6, %v482_v6, 0.0 }
 0x297   :  { %vm463_vm0 = vcmp.gt.f32.partialorder %v455_v8, 0.0  ;;  %v467_v12 = vmul.f32 0.01, %v455_v8  ;;  %v502_v13 = vrot.slane %v483_v9, 2  ;;  %v524_v14 = vrot.slane %v483_v9, 4 }
 0x298   :  { %v504_v15 = vrot.slane %v495_v50, 2  ;;  %v526_v21 = vrot.slane %v495_v50, 4 }
 0x299   :  { %v471_v17 = vsel %vm463_vm0, %v455_v8, %v467_v12  ;;  %v503_v55 = vsel %vm183_vm7, %v501_v10, %v502_v13  ;;  %v525_v18 = vsel %vm162_vm1, %v523_v11, %v524_v14  ;;  %vm967_vm0 = vcmask 80896  }
 0x29a   :  { %511 = vrot.lane.b32.xlu2 %v503_v55, %s1259_s16  ;;  %533 = vrot.lane.b32.xlu0 %v525_v18, %s1258_s15  ;;  %v505_v19 = vsel %vm183_vm7, %v502_v13, %v504_v15  ;;  %v1601_v20 = vadd.f32 %v471_v17, %v1505_v7  ;;  %v527_v27 = vsel %vm162_vm1, %v524_v14, %v526_v21 }
 0x29b   :  { %513 = vrot.lane.b32.xlu1 %v505_v19, %s1259_s16 }
 0x29c   :  { %v484_v23 = vrot.slane %v1601_v20, 6 }
 0x29e   :  { %v458_v22 = vpop.f32.mrf.mxu2  ;;  %v494_v29 = vsel %vm228_vm6, 0.0, %v484_v23 }
 0x29f   :  { %vm464_vm2 = vcmp.gt.f32.partialorder %v458_v22, 0.0  ;;  %v468_v25 = vmul.f32 0.01, %v458_v22  ;;  %v528_v31 = vrot.slane %v494_v29, 4  ;;  %v506_v36 = vrot.slane %v494_v29, 2 }
 0x2a1   :  { %v472_v26 = vsel %vm464_vm2, %v458_v22, %v468_v25  ;;  %vm969_vm2 = vcmask 162816  }
 0x2a2   :  { %v1607_v28 = vadd.f32 %v472_v26, %v1512_v16  ;;  %535 = vrot.lane.b32.xlu2 %v527_v27, %s1258_s15 }
 0x2a4   :  { %v485_v7 = vrot.slane %v1607_v28, 6 }
 0x2a6   :  { %v486_v30 = vsel %vm228_vm6, %v484_v23, %v485_v7  ;;  %v496_v32 = vsel %vm228_vm6, %v485_v7, 0.0 }
 0x2a7   :  { %v529_v34 = vrot.slane %v486_v30, 4  ;;  %v507_v35 = vrot.slane %v486_v30, 2  ;;  %v509_v24 = vrot.slane %v496_v32, 2  ;;  %v531_v39 = vrot.slane %v496_v32, 4 }
 0x2a9   :  { %v530_v37 = vsel %vm162_vm1, %v528_v31, %v529_v34  ;;  %v510_v16 = vsel %vm183_vm7, %v507_v35, %v509_v24  ;;  %v508_v38 = vsel %vm183_vm7, %v506_v36, %v507_v35  ;;  %v532_v33 = vsel %vm162_vm1, %v529_v34, %v531_v39 }
 0x2aa   :  { %537 = vrot.lane.b32.xlu1 %v530_v37, %s1258_s15  ;;  %517 = vrot.lane.b32.xlu2 %v510_v16, %s1259_s16 }
 0x2ab   :  { %515 = vrot.lane.b32.xlu0 %v508_v38, %s1259_s16 }
 0x2b3   :  { %539 = vrot.lane.b32.xlu0 %v532_v33, %s1258_s15 }
 0x2f4   :  { %v512_v40 = vpop.permute.xlu2 %511 }
 0x2f5   :  { %v545_v41 = vsel %vm251_vm5, %v493_v5, %v512_v40 }
 0x2fc   :  { %v536_v43 = vpop.permute.xlu2 %535 }
 0x304   :  { %v518_v44 = vpop.permute.xlu2 %517 }
 0x305   :  { %v548_v54 = vsel %vm251_vm5, %v486_v30, %v518_v44 }
 0x30c   :  { %v534_v42 = vpop.permute.xlu0 %533 }
 0x30d   :  { %v549_v45 = vsel %vm256_vm8, %v545_v41, %v534_v42  ;;  %v514_v46 = vpop.permute.xlu1 %513 }
 0x30e   :  { %1182 = vmatmul.msk.f32.vlgmr.msra.gmra.mxu3 %vm261_vm9, %v549_v45  ;;  %v546_v47 = vsel %vm251_vm5, %v483_v9, %v514_v46 }
 0x30f   :  { %v550_v48 = vsel %vm256_vm8, %v546_v47, %v536_v43 }
 0x316   :  { %1183 = vmatmul.msk.f32.gmra.mxu3 %vm261_vm9, %v550_v48 }
 0x31c   :  { %v538_v49 = vpop.permute.xlu1 %537 }
 0x31d   :  { %v516_v51 = vpop.permute.xlu0 %515 }
 0x31e   :  { %v547_v52 = vsel %vm251_vm5, %v494_v29, %v516_v51 }
 0x31f   :  { %v551_v53 = vsel %vm256_vm8, %v547_v52, %v538_v49 }
 0x320   :  { %1184 = vmatmul.msk.f32.gmra.mxu3 %vm261_vm9, %v551_v53 }
 0x325   :  { %v540_v56 = vpop.permute.xlu0 %539 }
 0x326   :  { %v552_v57 = vsel %vm256_vm8, %v548_v54, %v540_v56 }
 0x328   :  { %1185 = vmatmul.msk.f32.gmra.mxu3 %vm261_vm9, %v552_v57 }
 0x391   :  { %v582_v58 = vpop.f32.mrf.mxu3 }
 0x392   :  { %vm594_vm3 = vcmp.gt.f32.partialorder %v582_v58, 0.0  ;;  %v598_v59 = vmul.f32 0.01, %v582_v58 }
 0x394   :  { %v602_v60 = vsel %vm594_vm3, %v582_v58, %v598_v59  ;;  %vm971_vm3 = vcmask 244736  }
 0x395   :  { %v1635_v61 = vadd.f32 %v602_v60, %v1585_v63 }
 0x397   :  { %v614_v1 = vrot.slane %v1635_v61, 6 }
 0x399   :  { %v585_v62 = vpop.f32.mrf.mxu3  ;;  %v626_v6 = vsel %vm228_vm6, 0.0, %v614_v1 }
 0x39a   :  { %vm595_vm4 = vcmp.gt.f32.partialorder %v585_v62, 0.0  ;;  %v599_v0 = vmul.f32 0.01, %v585_v62  ;;  %v656_v10 = vrot.slane %v626_v6, 4  ;;  %v634_v13 = vrot.slane %v626_v6, 2 }
 0x39c   :  { %v603_v2 = vsel %vm595_vm4, %v585_v62, %v599_v0  ;;  %vm973_vm4 = vcmask 326656  }
 0x39d   :  { %v1639_v3 = vadd.f32 %v603_v2, %v1589_v4 }
 0x39f   :  { %v615_v5 = vrot.slane %v1639_v3, 6 }
 0x3a1   :  { %v616_v8 = vsel %vm228_vm6, %v614_v1, %v615_v5  ;;  %v628_v9 = vsel %vm228_vm6, %v615_v5, 0.0 }
 0x3a2   :  { %v657_v63 = vrot.slane %v616_v8, 4  ;;  %v635_v11 = vrot.slane %v616_v8, 2  ;;  %v637_v50 = vrot.slane %v628_v9, 2  ;;  %v659_v19 = vrot.slane %v628_v9, 4 }
 0x3a3   :  { %v588_v12 = vpop.f32.mrf.mxu3 }
 0x3a4   :  { %vm596_vm10 = vcmp.gt.f32.partialorder %v588_v12, 0.0  ;;  %v600_v14 = vmul.f32 0.01, %v588_v12  ;;  %v658_v15 = vsel %vm162_vm1, %v656_v10, %v657_v63  ;;  %v638_v4 = vsel %vm183_vm7, %v635_v11, %v637_v50 }
 0x3a5   :  { %666 = vrot.lane.b32.xlu2 %v658_v15, %s1258_s15  ;;  %646 = vrot.lane.b32.xlu0 %v638_v4, %s1259_s16  ;;  %v636_v17 = vsel %vm183_vm7, %v634_v13, %v635_v11  ;;  %v660_v25 = vsel %vm162_vm1, %v657_v63, %v659_v19 }
 0x3a6   :  { %v604_v55 = vsel %vm596_vm10, %v588_v12, %v600_v14  ;;  %644 = vrot.lane.b32.xlu1 %v636_v17, %s1259_s16  ;;  %vm975_vm10 = vcmask 408576  }
 0x3a7   :  { %v1652_v18 = vadd.f32 %v604_v55, %v1601_v20 }
 0x3a9   :  { %v617_v22 = vrot.slane %v1652_v18, 6 }
 0x3ab   :  { %v591_v21 = vpop.f32.mrf.mxu3  ;;  %v627_v29 = vsel %vm228_vm6, 0.0, %v617_v22 }
 0x3ac   :  { %vm597_vm11 = vcmp.gt.f32.partialorder %v591_v21, 0.0  ;;  %v601_v23 = vmul.f32 0.01, %v591_v21  ;;  %v661_v30 = vrot.slane %v627_v29, 4  ;;  %v639_v24 = vrot.slane %v627_v29, 2 }
 0x3ae   :  { %v605_v26 = vsel %vm597_vm11, %v591_v21, %v601_v23  ;;  %668 = vrot.lane.b32.xlu1 %v660_v25, %s1258_s15  ;;  %vm977_vm11 = vcmask 490496  }
 0x3af   :  { %v1658_v27 = vadd.f32 %v605_v26, %v1607_v28 }
 0x3b1   :  { %v618_v7 = vrot.slane %v1658_v27, 6 }
 0x3b3   :  { %v619_v20 = vsel %vm228_vm6, %v617_v22, %v618_v7  ;;  %v629_v31 = vsel %vm228_vm6, %v618_v7, 0.0 }
 0x3b4   :  { %v662_v32 = vrot.slane %v619_v20, 4  ;;  %v640_v34 = vrot.slane %v619_v20, 2  ;;  %v642_v35 = vrot.slane %v629_v31, 2  ;;  %v664_v16 = vrot.slane %v629_v31, 4 }
 0x3b6   :  { %v663_v36 = vsel %vm162_vm1, %v661_v30, %v662_v32  ;;  %v643_v37 = vsel %vm183_vm7, %v640_v34, %v642_v35  ;;  %v641_v28 = vsel %vm183_vm7, %v639_v24, %v640_v34  ;;  %v665_v38 = vsel %vm162_vm1, %v662_v32, %v664_v16 }
 0x3b7   :  { %670 = vrot.lane.b32.xlu0 %v663_v36, %s1258_s15  ;;  %650 = vrot.lane.b32.xlu1 %v643_v37, %s1259_s16 }
 0x3b8   :  { %648 = vrot.lane.b32.xlu2 %v641_v28, %s1259_s16 }
 0x3c0   :  { %672 = vrot.lane.b32.xlu2 %v665_v38, %s1258_s15 }
 0x3ff   :  { %v667_v33 = vpop.permute.xlu2 %666 }
 0x412   :  { %v649_v43 = vpop.permute.xlu2 %648 }
 0x413   :  { %v680_v48 = vsel %vm251_vm5, %v627_v29, %v649_v43  ;;  %v73_v43 = vld [vmem:[%s1892_s4 + $0x8] sm:$0xff] }
 0x417   :  { %v647_v42 = vpop.permute.xlu0 %646 }
 0x418   :  { %v645_v39 = vpop.permute.xlu1 %644  ;;  %v679_v45 = vsel %vm251_vm5, %v616_v8, %v647_v42  ;;  %v82_v8 = vld [vmem:[%s1892_s4 + $0x50] sm:$0xff]  ;;  %v77_v42 = vld [vmem:[%s1892_s4 + $0x28] sm:$0xff] }
 0x419   :  { %v678_v40 = vsel %vm251_vm5, %v626_v6, %v645_v39  ;;  %v83_v6 = vld [vmem:[%s1892_s4 + $0x58] sm:$0xff]  ;;  %v81_v39 = vld [vmem:[%s1892_s4 + $0x48] sm:$0xff] }
 0x41a   :  { %v682_v41 = vsel %vm256_vm8, %v678_v40, %v667_v33  ;;  %v673_v44 = vpop.permute.xlu2 %672  ;;  %835 = vmatpush.msrb.mxu2 %v83_v6  ;;  %v80_v33 = vld [vmem:[%s1892_s4 + $0x40] sm:$0xff]  ;;  %v79_v40 = vld [vmem:[%s1892_s4 + $0x38] sm:$0xff] }
 0x41b   :  { %1186 = vmatmul.msk.f32.vlgmr.msrb.gmra.mxu1 %vm261_vm9, %v682_v41  ;;  %v78_v41 = vld [vmem:[%s1892_s4 + $0x30] sm:$0xff] }
 0x41c   :  { %836 = vmatpush.msrb.mxu2 %v82_v8 }
 0x41e   :  { %837 = vmatpush.msrb.mxu2 %v81_v39 }
 0x420   :  { %v669_v46 = vpop.permute.xlu1 %668  ;;  %838 = vmatpush.msrb.mxu2 %v80_v33 }
 0x421   :  { %v683_v47 = vsel %vm256_vm8, %v679_v45, %v669_v46  ;;  %v76_v45 = vld [vmem:[%s1892_s4 + $0x20] sm:$0xff]  ;;  %v75_v46 = vld [vmem:[%s1892_s4 + $0x18] sm:$0xff] }
 0x422   :  { %839 = vmatpush.msrb.mxu2 %v79_v40 }
 0x423   :  { %1187 = vmatmul.msk.f32.gmra.mxu1 %vm261_vm9, %v683_v47  ;;  %v74_v47 = vld [vmem:[%s1892_s4 + $0x10] sm:$0xff] }
 0x424   :  { %840 = vmatpush.msrb.mxu2 %v78_v41 }
 0x426   :  { %841 = vmatpush.msrb.mxu2 %v77_v42 }
 0x428   :  { %842 = vmatpush.msrb.mxu2 %v76_v45 }
 0x429   :  { %v671_v49 = vpop.permute.xlu0 %670  ;;  %v651_v52 = vpop.permute.xlu1 %650 }
 0x42a   :  { %v684_v51 = vsel %vm256_vm8, %v680_v48, %v671_v49  ;;  %v681_v53 = vsel %vm251_vm5, %v619_v20, %v651_v52  ;;  %843 = vmatpush.msrb.mxu2 %v75_v46  ;;  %v72_v48 = vld [vmem:[%s1892_s4] sm:$0xff]  ;;  %s1260_s4 = smov 10  }
 0x42b   :  { %1188 = vmatmul.msk.f32.gmra.mxu1 %vm261_vm9, %v684_v51  ;;  %v685_v54 = vsel %vm256_vm8, %v681_v53, %v673_v44 }
 0x42c   :  { %844 = vmatpush.msrb.mxu2 %v74_v47 }
 0x42e   :  { %845 = vmatpush.msrb.mxu2 %v73_v43 }
 0x430   :  { %846 = vmatpush.msrb.mxu2 %v72_v48 }
 0x433   :  { %1189 = vmatmul.msk.f32.gmra.mxu1 %vm261_vm9, %v685_v54 }
 0x498   :  { %v715_v56 = vpop.f32.mrf.mxu1 }
 0x499   :  { %vm727_vm12 = vcmp.gt.f32.partialorder %v715_v56, 0.0  ;;  %v731_v57 = vmul.f32 0.01, %v715_v56 }
 0x49b   :  { %v735_v58 = vsel %vm727_vm12, %v715_v56, %v731_v57  ;;  %vm979_vm12 = vcmask 572416  }
 0x49c   :  { %v739_v59 = vadd.f32 %v735_v58, %v1635_v61 }
 0x49e   :  { %v747_v62 = vrot.slane %v739_v59, 6 }
 0x4a0   :  { %v718_v60 = vpop.f32.mrf.mxu1  ;;  %v1687_v5 = vsel %vm228_vm6, 0.0, %v747_v62 }
 0x4a1   :  { %vm728_vm13 = vcmp.gt.f32.partialorder %v718_v60, 0.0  ;;  %v732_v0 = vmul.f32 0.01, %v718_v60  ;;  %v767_v11 = vrot.slane %v1687_v5, 2 }
 0x4a3   :  { %v736_v1 = vsel %vm728_vm13, %v718_v60, %v732_v0  ;;  %vm981_vm13 = vcmask 654336  }
 0x4a4   :  { %v740_v2 = vadd.f32 %v736_v1, %v1639_v3  ;;  %v789_v3 = vrot.slane %v1687_v5, 4 }
 0x4a6   :  { %v748_v9 = vrot.slane %v740_v2, 6 }
 0x4a8   :  { %v761_v61 = vsel %vm228_vm6, %v748_v9, 0.0  ;;  %v721_v10 = vpop.f32.mrf.mxu1  ;;  %v1697_v63 = vsel %vm228_vm6, %v747_v62, %v748_v9 }
 0x4a9   :  { %vm729_vm14 = vcmp.gt.f32.partialorder %v721_v10, 0.0  ;;  %v733_v50 = vmul.f32 0.01, %v721_v10  ;;  %v790_v12 = vrot.slane %v1697_v63, 4  ;;  %v768_v13 = vrot.slane %v1697_v63, 2 }
 0x4aa   :  { %v770_v14 = vrot.slane %v761_v61, 2  ;;  %v792_v21 = vrot.slane %v761_v61, 4 }
 0x4ab   :  { %v737_v15 = vsel %vm729_vm14, %v721_v10, %v733_v50  ;;  %v791_v4 = vsel %vm162_vm1, %v789_v3, %v790_v12  ;;  %v769_v17 = vsel %vm183_vm7, %v767_v11, %v768_v13  ;;  %vm983_vm14 = vcmask 736256  }
 0x4ac   :  { %799 = vrot.lane.b32.xlu1 %v791_v4, %s1258_s15  ;;  %v771_v55 = vsel %vm183_vm7, %v768_v13, %v770_v14  ;;  %777 = vrot.lane.b32.xlu0 %v769_v17, %s1259_s16  ;;  %v741_v19 = vadd.f32 %v737_v15, %v1652_v18  ;;  %v793_v29 = vsel %vm162_vm1, %v790_v12, %v792_v21 }
 0x4ad   :  { %779 = vrot.lane.b32.xlu2 %v771_v55, %s1259_s16 }
 0x4ae   :  { %v750_v23 = vrot.slane %v741_v19, 6 }
 0x4b0   :  { %v724_v22 = vpop.f32.mrf.mxu1  ;;  %v760_v20 = vsel %vm228_vm6, 0.0, %v750_v23 }
 0x4b1   :  { %vm730_vm15 = vcmp.gt.f32.partialorder %v724_v22, 0.0  ;;  %v734_v25 = vmul.f32 0.01, %v724_v22  ;;  %v794_v32 = vrot.slane %v760_v20, 4  ;;  %v772_v36 = vrot.slane %v760_v20, 2 }
 0x4b3   :  { %v738_v26 = vsel %vm730_vm15, %v724_v22, %v734_v25  ;;  %vm985_vm15 = vcmask 818176  }
 0x4b4   :  { %v742_v7 = vadd.f32 %v738_v26, %v1658_v27  ;;  %801 = vrot.lane.b32.xlu0 %v793_v29, %s1258_s15 }
 0x4b6   :  { %v751_v30 = vrot.slane %v742_v7, 6 }
 0x4b8   :  { %v762_v31 = vsel %vm228_vm6, %v751_v30, 0.0  ;;  %v752_v18 = vsel %vm228_vm6, %v750_v23, %v751_v30 }
 0x4b9   :  { %v795_v34 = vrot.slane %v752_v18, 4  ;;  %v773_v35 = vrot.slane %v752_v18, 2  ;;  %v775_v24 = vrot.slane %v762_v31, 2  ;;  %v797_v16 = vrot.slane %v762_v31, 4 }
 0x4bb   :  { %v796_v37 = vsel %vm162_vm1, %v794_v32, %v795_v34  ;;  %v776_v28 = vsel %vm183_vm7, %v773_v35, %v775_v24  ;;  %v774_v27 = vsel %vm183_vm7, %v772_v36, %v773_v35  ;;  %v798_v38 = vsel %vm162_vm1, %v795_v34, %v797_v16 }
 0x4bc   :  { %803 = vrot.lane.b32.xlu2 %v796_v37, %s1258_s15  ;;  %783 = vrot.lane.b32.xlu0 %v776_v28, %s1259_s16  ;;  %vm875_vm7 = vcmask 1041409  }
 0x4bd   :  { %781 = vrot.lane.b32.xlu1 %v774_v27, %s1259_s16  ;;  %s1270_s16 = smov 120  }
 0x4c5   :  { %805 = vrot.lane.b32.xlu1 %v798_v38, %s1258_s15  ;;  %s1272_s15 = smov 2  }
 0x507   :  { %v780_v44 = vpop.permute.xlu2 %779 }
 0x508   :  { %v812_v54 = vsel %vm251_vm5, %v1697_v63, %v780_v44 }
 0x516   :  { %v804_v59 = vpop.permute.xlu2 %803 }
 0x51e   :  { %v778_v49 = vpop.permute.xlu0 %777  ;;  %v800_v51 = vpop.permute.xlu1 %799 }
 0x51f   :  { %v811_v52 = vsel %vm251_vm5, %v1687_v5, %v778_v49 }
 0x520   :  { %v815_v53 = vsel %vm256_vm8, %v811_v52, %v800_v51 }
 0x521   :  { %1190 = vmatmul.msk.f32.vlgmr.msrb.gmra.mxu2 %vm261_vm9, %v815_v53 }
 0x526   :  { %v802_v56 = vpop.permute.xlu0 %801 }
 0x527   :  { %v816_v57 = vsel %vm256_vm8, %v812_v54, %v802_v56 }
 0x529   :  { %1191 = vmatmul.msk.f32.gmra.mxu2 %vm261_vm9, %v816_v57 }
 0x52e   :  { %v784_v0 = vpop.permute.xlu0 %783 }
 0x52f   :  { %v782_v58 = vpop.permute.xlu1 %781  ;;  %v814_v1 = vsel %vm251_vm5, %v752_v18, %v784_v0  ;;  %v95_v0 = vld [vmem:[%s1893_s5 + $0x58] sm:$0xff] }
 0x530   :  { %v813_v60 = vsel %vm251_vm5, %v760_v20, %v782_v58  ;;  %v99_v58 = vld [vmem:[%s1893_s5 + $0x78] sm:$0xff] }
 0x531   :  { %v817_v62 = vsel %vm256_vm8, %v813_v60, %v804_v59  ;;  %v98_v59 = vld [vmem:[%s1893_s5 + $0x70] sm:$0xff]  ;;  %1003 = vmatpush.msrb.mxu3 %v99_v58  ;;  %v97_v60 = vld [vmem:[%s1893_s5 + $0x68] sm:$0xff] }
 0x532   :  { %1192 = vmatmul.msk.f32.gmra.mxu2 %vm261_vm9, %v817_v62  ;;  %v96_v62 = vld [vmem:[%s1893_s5 + $0x60] sm:$0xff] }
 0x533   :  { %1004 = vmatpush.msrb.mxu3 %v98_v59 }
 0x535   :  { %1005 = vmatpush.msrb.mxu3 %v97_v60 }
 0x537   :  { %v806_v2 = vpop.permute.xlu1 %805  ;;  %1006 = vmatpush.msrb.mxu3 %v96_v62 }
 0x538   :  { %v818_v5 = vsel %vm256_vm8, %v814_v1, %v806_v2  ;;  %v103_v1 = vld [vmem:[%s1893_s5 + $0x98] sm:$0xff]  ;;  %v94_v2 = vld [vmem:[%s1893_s5 + $0x50] sm:$0xff] }
 0x539   :  { %1035 = vmatpush.msrb.mxu0 %v103_v1  ;;  %1007 = vmatpush.msrb.mxu3 %v95_v0 }
 0x53a   :  { %1193 = vmatmul.msk.f32.gmra.mxu2 %vm261_vm9, %v818_v5  ;;  %v93_v5 = vld [vmem:[%s1893_s5 + $0x48] sm:$0xff] }
 0x53b   :  { %1008 = vmatpush.msrb.mxu3 %v94_v2 }
 0x53d   :  { %1009 = vmatpush.msrb.mxu3 %v93_v5 }
 0x5a4   :  { %v848_v6 = vpop.f32.mrf.mxu2 }
 0x5a5   :  { %v864_v9 = vmul.f32 0.01, %v848_v6  ;;  %vm860_vm1 = vcmp.gt.f32.partialorder %v848_v6, 0.0 }
 0x5a7   :  { %v868_v61 = vsel %vm860_vm1, %v848_v6, %v864_v9  ;;  %v92_v6 = vld [vmem:[%s1893_s5 + $0x40] sm:$0xff]  ;;  %v102_v9 = vld [vmem:[%s1893_s5 + $0x90] sm:$0xff]  ;;  %vm987_vm1 = vcmask 900096  }
 0x5a8   :  { %v878_v3 = vrot.slane %v868_v61, 1  ;;  %v889_v50 = vrot.slane %v868_v61, 3  ;;  %v883_v14 = vrot.slane %v868_v61, 2  ;;  %v895_v23 = vrot.slane %v868_v61, 4  ;;  %1010 = vmatpush.msrb.mxu3 %v92_v6  ;;  %1036 = vmatpush.msrb.mxu0 %v102_v9  ;;  %v113_v6 = vld [vmem:[%s1897_s9 + $0x18] sm:$0xff]  ;;  %v111_v9 = vld [vmem:[%s1897_s9 + $0x8] sm:$0xff] }
 0x5a9   :  { %v907_v20 = vrot.slane %v868_v61, 6  ;;  %v901_v30 = vrot.slane %v868_v61, 5  ;;  %v913_v36 = vrot.slane %v868_v61, 7 }
 0x5ac   :  { %v851_v8 = vpop.f32.mrf.mxu2 }
 0x5ad   :  { %v865_v31 = vmul.f32 0.01, %v851_v8  ;;  %vm861_vm9 = vcmp.gt.f32.partialorder %v851_v8, 0.0 }
 0x5af   :  { %v869_v24 = vsel %vm861_vm9, %v851_v8, %v865_v31  ;;  %v91_v8 = vld [vmem:[%s1893_s5 + $0x38] sm:$0xff]  ;;  %vm995_vm9 = vcmask 179200  }
 0x5b0   :  { %v926_v27 = vrot.slane %v869_v24, 1  ;;  %v931_v33 = vrot.slane %v869_v24, 2  ;;  %v943_v45 = vrot.slane %v869_v24, 4  ;;  %v937_v46 = vrot.slane %v869_v24, 3  ;;  %1011 = vmatpush.msrb.mxu3 %v91_v8  ;;  %v112_v8 = vld [vmem:[%s1897_s9 + $0x10] sm:$0xff] }
 0x5b1   :  { %v949_v49 = vrot.slane %v869_v24, 5  ;;  %v961_v44 = vrot.slane %v869_v24, 7  ;;  %v955_v54 = vrot.slane %v869_v24, 6 }
 0x5b5   :  { %v854_v10 = vpop.f32.mrf.mxu2 }
 0x5b6   :  { %vm862_vm6 = vcmp.gt.f32.partialorder %v854_v10, 0.0  ;;  %v866_v63 = vmul.f32 0.01, %v854_v10 }
 0x5b8   :  { %v870_v11 = vsel %vm862_vm6, %v854_v10, %v866_v63  ;;  %v89_v10 = vld [vmem:[%s1893_s5 + $0x28] sm:$0xff]  ;;  %v88_v63 = vld [vmem:[%s1893_s5 + $0x20] sm:$0xff]  ;;  %vm989_vm6 = vcmask 982016  }
 0x5b9   :  { %v879_v12 = vsel %vm875_vm7, %v870_v11, %v878_v3  ;;  %v890_v13 = vrot.slane %v870_v11, 2  ;;  %v884_v15 = vrot.slane %v870_v11, 1  ;;  %v874_v4 = vrot.slane %v870_v11, 7  ;;  %v87_v3 = vld [vmem:[%s1893_s5 + $0x18] sm:$0xff] }
 0x5ba   :  { %880 = vrot.lane.b32.xlu2 %v879_v12, %s1260_s4  ;;  %v896_v21 = vrot.slane %v870_v11, 3  ;;  %v908_v25 = vrot.slane %v870_v11, 5  ;;  %v902_v26 = vrot.slane %v870_v11, 4  ;;  %v914_v35 = vrot.slane %v870_v11, 6  ;;  %v101_v11 = vld [vmem:[%s1893_s5 + $0x88] sm:$0xff] }
 0x5bb   :  { %v891_v17 = vsel %vm875_vm7, %v890_v13, %v889_v50  ;;  %v885_v55 = vsel %vm875_vm7, %v884_v15, %v883_v14  ;;  %v1772_v22 = vsel %vm875_vm7, %v874_v4, %v868_v61  ;;  %v90_v61 = vld [vmem:[%s1893_s5 + $0x30] sm:$0xff]  ;;  %1037 = vmatpush.msrb.mxu0 %v101_v11  ;;  %v85_v12 = vld [vmem:[%s1893_s5 + $0x8] sm:$0xff]  ;;  %v84_v14 = vld [vmem:[%s1893_s5] sm:$0xff] }
 0x5bc   :  { %892 = vrot.lane.b32.xlu1 %v891_v17, %s1261_s0  ;;  %886 = vrot.lane.b32.xlu0 %v885_v55, %s1262_s14  ;;  %v897_v7 = vsel %vm875_vm7, %v896_v21, %v895_v23  ;;  %v909_v18 = vsel %vm875_vm7, %v908_v25, %v907_v20  ;;  %v903_v32 = vsel %vm875_vm7, %v902_v26, %v901_v30  ;;  %v86_v50 = vld [vmem:[%s1893_s5 + $0x10] sm:$0xff]  ;;  %v100_v15 = vld [vmem:[%s1893_s5 + $0x80] sm:$0xff]  ;;  %s1275_s0 = smov [#allocation2]  }
 0x5bd   :  { %v857_v19 = vpop.f32.mrf.mxu2  ;;  %v915_v28 = vsel %vm875_vm7, %v914_v35, %v913_v36  ;;  %1012 = vmatpush.msrb.mxu3 %v90_v61  ;;  %1038 = vmatpush.msrb.mxu0 %v100_v15  ;;  %v110_v61 = vld [vmem:[%s1897_s9] sm:$0xff]  ;;  %s1163_s14 = sshll.u32 %s1275_s0, 4  ;;  %s1165_s9 = sshll.u32 %s1899_s11, 4  ;;  %s1164_s14 = int_to_ptr.vmem [resolvable:$true] %s1163_s14  ;;  %s1166_s9 = int_to_ptr.hbm [resolvable:$true] %s1165_s9 }
 0x5be   :  { %v867_v29 = vmul.f32 0.01, %v857_v19  ;;  %vm863_vm8 = vcmp.gt.f32.partialorder %v857_v19, 0.0 }
 0x5bf   :  { %1013 = vmatpush.msrb.mxu3 %v89_v10 }
 0x5c0   :  { %v871_v34 = vsel %vm863_vm8, %v857_v19, %v867_v29  ;;  %vm993_vm8 = vcmask 97280  }
 0x5c1   :  { %v921_v37 = vrot.slane %v871_v34, 7  ;;  %v927_v16 = vsel %vm875_vm7, %v871_v34, %v926_v27  ;;  %v932_v39 = vrot.slane %v871_v34, 1  ;;  %v944_v40 = vrot.slane %v871_v34, 3  ;;  %1014 = vmatpush.msrb.mxu3 %v88_v63 }
 0x5c2   :  { %898 = vrot.lane.b32.xlu2 %v897_v7, %s1263_s1  ;;  %v938_v41 = vrot.slane %v871_v34, 2  ;;  %v950_v48 = vrot.slane %v871_v34, 4  ;;  %v962_v51 = vrot.slane %v871_v34, 6  ;;  %v956_v52 = vrot.slane %v871_v34, 5 }
 0x5c3   :  { %v922_v38 = vsel %vm875_vm7, %v921_v37, %v869_v24  ;;  %v933_v42 = vsel %vm875_vm7, %v932_v39, %v931_v33  ;;  %v945_v47 = vsel %vm875_vm7, %v944_v40, %v943_v45  ;;  %1015 = vmatpush.msrb.mxu3 %v87_v3  ;;  %v107_v45 = vld [vmem:[%s1895_s7 + $0x10] sm:$0xff] }
 0x5c4   :  { %910 = vrot.lane.b32.xlu1 %v909_v18, %s1264_s17  ;;  %904 = vrot.lane.b32.xlu0 %v903_v32, %s1265_s18  ;;  %v939_v43 = vsel %vm875_vm7, %v938_v41, %v937_v46  ;;  %v951_v53 = vsel %vm875_vm7, %v950_v48, %v949_v49  ;;  %v963_v56 = vsel %vm875_vm7, %v962_v51, %v961_v44  ;;  %v106_v46 = vld [vmem:[%s1895_s7 + $0x8] sm:$0xff] }
 0x5c5   :  { %v957_v57 = vsel %vm875_vm7, %v956_v52, %v955_v54  ;;  %1016 = vmatpush.msrb.mxu3 %v86_v50  ;;  %vm991_vm7 = vcmask 15360   ;;  %v1228_v54 = vld [vmem:[%s1896_s8] ss:$0 sm:$0xff] }
 0x5c7   :  { %1017 = vmatpush.msrb.mxu3 %v85_v12  ;;  %v1229_v12 = vld [vmem:[%s1898_s10] ss:$0 sm:$0xff] }
 0x5c9   :  { %1018 = vmatpush.msrb.mxu3 %v84_v14 }
 0x5ca   :  { %916 = vrot.lane.b32.xlu2 %v915_v28, %s1266_s19 }
 0x5cc   :  { %928 = vrot.lane.b32.xlu1 %v927_v16, %s1267_s20  ;;  %923 = vrot.lane.b32.xlu0 %v922_v38, %s1268_s21 }
 0x5d2   :  { %934 = vrot.lane.b32.xlu2 %v933_v42, %s1269_s22  ;;  %v108_v42 = vld [vmem:[%s1895_s7 + $0x18] sm:$0xff] }
 0x5d3   :  { %1064 = vmatpush.msra.mxu3 %v108_v42  ;;  %1091 = vmatpush.msra.mxu0 %v108_v42 }
 0x5d4   :  { %946 = vrot.lane.b32.xlu1 %v945_v47, %s1270_s16  ;;  %940 = vrot.lane.b32.xlu0 %v939_v43, %s1271_s23  ;;  %v105_v47 = vld [vmem:[%s1895_s7] sm:$0xff] }
 0x5d5   :  { %1118 = vmatpush.msra.mxu1 %v108_v42  ;;  %1065 = vmatpush.msra.mxu3 %v107_v45  ;;  %v1227_v43 = vld [vmem:[%s1894_s6] ss:$0 sm:$0xff] }
 0x5d6   :  { %1092 = vmatpush.msra.mxu0 %v107_v45 }
 0x5d7   :  { %1119 = vmatpush.msra.mxu1 %v107_v45  ;;  %1066 = vmatpush.msra.mxu3 %v106_v46 }
 0x5d8   :  { %1093 = vmatpush.msra.mxu0 %v106_v46 }
 0x5d9   :  { %1120 = vmatpush.msra.mxu1 %v106_v46  ;;  %1067 = vmatpush.msra.mxu3 %v105_v47 }
 0x5da   :  { %952 = vrot.lane.b32.xlu2 %v951_v53, %s1272_s15  ;;  %1094 = vmatpush.msra.mxu0 %v105_v47 }
 0x5db   :  { %1121 = vmatpush.msra.mxu1 %v105_v47 }
 0x5dc   :  { %964 = vrot.lane.b32.xlu1 %v963_v56, %s1273_s24  ;;  %958 = vrot.lane.b32.xlu0 %v957_v57, %s1274_s25 }
 0x614   :  { %v881_v13 = vpop.permute.xlu2 %880 }
 0x615   :  { %v968_v19 = vsel %vm967_vm0, %v1772_v22, %v881_v13 }
 0x61c   :  { %v899_v55 = vpop.permute.xlu2 %898 }
 0x624   :  { %v917_v7 = vpop.permute.xlu2 %916 }
 0x62c   :  { %v935_v22 = vpop.permute.xlu2 %934 }
 0x62e   :  { %v887_v4 = vpop.permute.xlu0 %886  ;;  %v893_v17 = vpop.permute.xlu1 %892 }
 0x62f   :  { %v970_v21 = vsel %vm969_vm2, %v968_v19, %v887_v4 }
 0x630   :  { %v972_v23 = vsel %vm971_vm3, %v970_v21, %v893_v17 }
 0x631   :  { %v974_v29 = vsel %vm973_vm4, %v972_v23, %v899_v55 }
 0x634   :  { %v953_v16 = vpop.permute.xlu2 %952 }
 0x636   :  { %v905_v25 = vpop.permute.xlu0 %904  ;;  %v911_v26 = vpop.permute.xlu1 %910 }
 0x637   :  { %v976_v20 = vsel %vm975_vm10, %v974_v29, %v905_v25  ;;  %vm1156_vm10 = vcmask 91136  }
 0x638   :  { %v978_v30 = vsel %vm977_vm11, %v976_v20, %v911_v26 }
 0x639   :  { %v980_v32 = vsel %vm979_vm12, %v978_v30, %v917_v7 }
 0x63e   :  { %v924_v31 = vpop.permute.xlu0 %923  ;;  %v929_v18 = vpop.permute.xlu1 %928 }
 0x63f   :  { %v982_v34 = vsel %vm981_vm13, %v980_v32, %v924_v31 }
 0x640   :  { %v984_v35 = vsel %vm983_vm14, %v982_v34, %v929_v18 }
 0x641   :  { %v986_v36 = vsel %vm985_vm15, %v984_v35, %v935_v22 }
 0x646   :  { %v941_v24 = vpop.permute.xlu0 %940  ;;  %v947_v37 = vpop.permute.xlu1 %946 }
 0x647   :  { %v988_v28 = vsel %vm987_vm1, %v986_v36, %v941_v24  ;;  %v992_v38 = vsel %vm991_vm7, %v947_v37, %v953_v16 }
 0x648   :  { %v990_v27 = vsel %vm989_vm6, %v988_v28, %v947_v37 }
 0x649   :  { %1019 = vmatmul.f32.vlgmr.msrb.gmra.mxu3 %v990_v27 }
 0x64a   :  { %1148 = vmatpush.msrb.mxu3 %v113_v6 }
 0x64c   :  { %1149 = vmatpush.msrb.mxu3 %v112_v8 }
 0x64e   :  { %v959_v39 = vpop.permute.xlu0 %958  ;;  %v965_v33 = vpop.permute.xlu1 %964  ;;  %1150 = vmatpush.msrb.mxu3 %v111_v9 }
 0x64f   :  { %v994_v40 = vsel %vm993_vm8, %v992_v38, %v959_v39 }
 0x650   :  { %v996_v41 = vsel %vm995_vm9, %v994_v40, %v965_v33  ;;  %1151 = vmatpush.msrb.mxu3 %v110_v61 }
 0x651   :  { %1194 = vmatmul.msk.f32.vlgmr.msrb.gmra.mxu0 %vm251_vm5, %v996_v41 }
 0x6cc   :  { %v1020_v48 = vpop.f32.mrf.mxu3 }
 0x6cd   :  { %v1021_v49 = vadd.f32 %v1227_v43, %v1020_v48 }
 0x6ce   :  { %v1040_v51 = vpop.f32.mrf.mxu0 }
 0x6cf   :  { %v1041_v52 = vadd.f32 %v1040_v51, %v1021_v49 }
 0x6d1   :  { %vm1043_vm0 = vcmp.gt.f32.partialorder %v1041_v52, 0.0  ;;  %v1044_v53 = vmul.f32 0.01, %v1041_v52 }
 0x6d3   :  { %v1045_v44 = vsel %vm1043_vm0, %v1041_v52, %v1044_v53 }
 0x6d4   :  { %1195 = vmatmul.msk.f32.vlgmr.msra.gmra.mxu3 %vm251_vm5, %v1045_v44 }
 0x757   :  { %v1069_v56 = vpop.f32.mrf.mxu3 }
 0x758   :  { %v1070_v57 = vadd.f32 %v1228_v54, %v1069_v56 }
 0x75a   :  { %vm1072_vm2 = vcmp.gt.f32.partialorder %v1070_v57, 0.0  ;;  %v1073_v58 = vmul.f32 0.01, %v1070_v57 }
 0x75c   :  { %v1074_v59 = vsel %vm1072_vm2, %v1070_v57, %v1073_v58 }
 0x75d   :  { %v1075_v60 = vadd.f32 %v1074_v59, %v1045_v44 }
 0x75f   :  { %1196 = vmatmul.msk.f32.vlgmr.msra.gmra.mxu0 %vm251_vm5, %v1075_v60 }
 0x7dc   :  { %v1096_v62 = vpop.f32.mrf.mxu0 }
 0x7dd   :  { %v1097_v0 = vadd.f32 %v1228_v54, %v1096_v62 }
 0x7df   :  { %vm1099_vm3 = vcmp.gt.f32.partialorder %v1097_v0, 0.0  ;;  %v1100_v1 = vmul.f32 0.01, %v1097_v0 }
 0x7e1   :  { %v1101_v2 = vsel %vm1099_vm3, %v1097_v0, %v1100_v1 }
 0x7e2   :  { %v1102_v5 = vadd.f32 %v1101_v2, %v1075_v60 }
 0x7e4   :  { %1197 = vmatmul.msk.f32.vlgmr.msra.gmra.mxu1 %vm251_vm5, %v1102_v5 }
 0x861   :  { %v1123_v10 = vpop.f32.mrf.mxu1 }
 0x862   :  { %v1124_v63 = vadd.f32 %v1228_v54, %v1123_v10 }
 0x864   :  { %vm1126_vm4 = vcmp.gt.f32.partialorder %v1124_v63, 0.0  ;;  %v1127_v3 = vmul.f32 0.01, %v1124_v63 }
 0x866   :  { %v1128_v11 = vsel %vm1126_vm4, %v1124_v63, %v1127_v3 }
 0x867   :  { %v1129_v50 = vadd.f32 %v1128_v11, %v1102_v5 }
 0x869   :  { %1198 = vmatmul.msk.f32.vlgmr.msrb.gmra.mxu3 %vm251_vm5, %v1129_v50 }
 0x8ec   :  { %v1153_v13 = vpop.f32.mrf.mxu3 }
 0x8ed   :  { %v1154_v14 = vadd.f32 %v1229_v12, %v1153_v13 }
 0x8ef   :  { %1157 = vst.msk [vmem:[#allocation2] sm:$0x3] %vm1156_vm10, %v1154_v14 }
 0x8f0   :  { %1168 = dma.vmem_to_hbm [thread:$0]  %s1164_s14, 32, %s1166_s9, [#allocation3]  }
 0x8f1   :  { %1254 = dma.done.wait [#allocation3], 32  }
 0x8f2   :  { %1255 = vsyncadd [#allocation3], 4294967264 }
 0x8f3   :  { %1173 = vsyncpa [#allocation3], 1 }

</bundles_post_ra>
